<compile_context>
chip_gen: v5e
topology: v5e:2x2
jax: 0.10.0
libtpu: 0.0.40
codegen_flags: <defaults>
</compile_context>

<pallas_src>
import jax
import jax.numpy as jnp
from jax.experimental import pallas as pl
from jax.experimental.pallas import tpu as pltpu


# ------------------------------------------------------------------ utils ----
def _round_up(x, m):
    return (x + m - 1) // m * m


def _chip_info():
    """Best-effort (vmem_capacity_bytes, tensorcores_per_chip); safe fallbacks."""
    vmem_cap, num_cores = 128 << 20, 1
    try:
        info = pltpu.get_tpu_info()
        vmem_cap = int(getattr(info, "vmem_capacity_bytes", vmem_cap))
        for attr in ("num_tensorcores", "tensorcore_count", "num_cores", "core_count"):
            val = getattr(info, attr, None)
            if val:
                num_cores = int(val)
                break
    except Exception:
        pass
    return vmem_cap, num_cores


# ----------------------------------------------------------------- kernel ----
def _gnae_kernel(obs_ref,
                 we0, be0, we1, be1, we2, be2,     # encoder (lane-padded)
                 wd0, bd0, wd1, bd1,               # decoder (lane-padded)
                 wh, bh,                           # fused actor|critic head (lane-padded)
                 out_ref):
    cdt = we0.dtype  # matmul-input dtype: bf16 on the perf path, f32 on the exact path

    def dense(x, w_ref, b_ref, relu):
        # MXU matmul with f32 accumulation; bias add + ReLU in f32; a single cast
        # of the result back to the matmul dtype (no per-layer input cast).
        y = jnp.dot(x, w_ref[...], preferred_element_type=jnp.float32) + b_ref[...]
        if relu:
            y = jnp.maximum(y, 0.0)
        return y.astype(cdt)

    x = obs_ref[...]                       # already in cdt (cast once in the wrapper)

    # ---- encoder ----
    h = dense(x, we0, be0, True)
    h = dense(h, we1, be1, True)
    g = dense(h, we2, be2, False)          # gaussian embedding: NO ReLU; padded lanes stay 0

    # ---- decoder ----
    d = dense(g, wd0, bd0, True)
    d = dense(d, wd1, bd1, True)

    # ---- fused actor|critic head (both end with ReLU; padded lanes are zeros) ----
    out_ref[...] = dense(d, wh, bh, True).astype(out_ref.dtype)


# ----------------------------------------------------- one-time param prep ----
def prepare_params(params, *, use_bf16=True):
    """Cast / fuse / lane-pad the module parameters ONCE (not per forward call)."""
    wdt = jnp.bfloat16 if use_bf16 else jnp.float32

    num_outputs = params["wa"].shape[1]
    head_width = num_outputs + 1                              # actor outputs | critic value
    head_pad = _round_up(max(head_width, 128), 128)           # lane-dense output slab

    def pad_w(w, rows, cols):
        r, c = w.shape
        return jnp.pad(w, ((0, rows - r), (0, cols - c))).astype(wdt)

    def pad_b(bias, cols):
        bias = jnp.asarray(bias).reshape(1, -1)               # robust to 1-D PyTorch biases
        return jnp.pad(bias, ((0, 0), (0, cols - bias.shape[1]))).astype(jnp.float32)

    obs_size = params["we0"].shape[0]
    # TODO(synk): if obs_size were large and 128-unaligned, pad obs + we0 rows too.
    e0 = _round_up(params["we0"].shape[1], 128)   # 200 -> 256
    e1 = _round_up(params["we1"].shape[1], 128)   # 500 -> 512
    e2 = _round_up(params["we2"].shape[1], 128)   # 8   -> 128
    d0 = _round_up(params["wd0"].shape[1], 128)   # 500 -> 512
    d1 = _round_up(params["wd1"].shape[1], 128)   # 200 -> 256

    # Fuse actor + critic heads into one matmul, then lane-pad with zeros.
    wh = jnp.concatenate([params["wa"], params["wc"]], axis=1)
    bh = jnp.concatenate([jnp.asarray(params["ba"]).reshape(1, -1),
                          jnp.asarray(params["bc"]).reshape(1, -1)], axis=1)

    ordered = (
        pad_w(params["we0"], obs_size, e0), pad_b(params["be0"], e0),
        pad_w(params["we1"], e0, e1),       pad_b(params["be1"], e1),
        pad_w(params["we2"], e1, e2),       pad_b(params["be2"], e2),
        pad_w(params["wd0"], e2, d0),       pad_b(params["bd0"], d0),
        pad_w(params["wd1"], d0, d1),       pad_b(params["bd1"], d1),
        pad_w(wh, d1, head_pad),            pad_b(bh, head_pad),
    )
    meta = dict(num_outputs=num_outputs, head_width=head_width, head_pad=head_pad,
                obs_size=obs_size, layer_widths=(e0, e1, e2, d0, d1, head_pad))
    return ordered, meta


# ----------------------------------------------------------------- wrapper ----
def _default_batch_tile(B, vmem_cap, num_cores):
    two_core = (num_cores >= 2) or (vmem_cap <= (72 << 20))   # v7x-like parts
    if two_core:
        if B <= 128:
            return B
        # >=2 grid steps so both TensorCores get work; 128-aligned rows, <=1024.
        return min(1024, _round_up(-(-B // 2), 128))
    # single-TC parts (v5e/v6e, 128 MiB VMEM): amortize the ~0.35us/step overhead.
    if B <= 256:
        return B
    return min(2048, _round_up((B + 1) // 2, 256))


def gnae_forward(obs, prepped, *, batch_tile=None):
    """Returns (action, value): forward() returns (action, []); value corresponds
    to value_function() applied to the same embedding."""
    ordered, meta = prepped
    B, obs_in_size = obs.shape
    assert obs_in_size == meta["obs_size"]
    num_outputs = meta["num_outputs"]
    head_width = meta["head_width"]
    head_pad = meta["head_pad"]

    cdt = ordered[0].dtype                      # bf16 (perf) or f32 (exact)
    obs_in = obs.astype(cdt)                    # halves the per-tile obs HBM read on bf16 path

    vmem_cap, num_cores = _chip_info()
    if batch_tile is None:
        batch_tile = _default_batch_tile(B, vmem_cap, num_cores)

    itemsize = jnp.dtype(cdt).itemsize
    params_bytes = sum(int(p.size) * p.dtype.itemsize for p in ordered)
    layer_sum = sum(meta["layer_widths"])

    def est_vmem(tile):
        act = tile * layer_sum * (4 + itemsize)             # f32 accumulators + cdt copies
        io = 2 * tile * (obs_in_size + head_pad) * itemsize  # double-buffered I/O tiles
        return 2 * params_bytes + act + io + (8 << 20)

    headroom = min(int(vmem_cap) - (8 << 20), 112 << 20)
    if vmem_cap <= (72 << 20):                               # 64 MiB parts: leave scratch room
        headroom = min(headroom, 56 << 20)
    while batch_tile > 128 and est_vmem(batch_tile) > headroom:
        batch_tile = max(128, _round_up(batch_tile // 2, 128))
    vmem_limit = int(min(headroom, max(32 << 20, est_vmem(batch_tile))))

    grid = (pl.cdiv(B, batch_tile),)
    in_specs = [pl.BlockSpec((batch_tile, obs_in_size), lambda i: (i, 0))]
    # Constant-index weight/bias blocks stay VMEM-resident across grid steps
    # (<2 MiB total in bf16 after padding, so default buffering is fine).
    in_specs += [pl.BlockSpec(p.shape, lambda i: (0, 0)) for p in ordered]
    out_specs = pl.BlockSpec((batch_tile, head_pad), lambda i: (i, 0))

    out = pl.pallas_call(
        _gnae_kernel,
        grid_spec=pltpu.PrefetchScalarGridSpec(
            num_scalar_prefetch=0,
            grid=grid,
            in_specs=in_specs,
            out_specs=out_specs,
        ),
        out_shape=jax.ShapeDtypeStruct((B, head_pad), cdt),
        compiler_params=pltpu.CompilerParams(
            dimension_semantics=("parallel",),
            vmem_limit_bytes=vmem_limit,
        ),
    )(obs_in, *ordered)

    action = out[:, :num_outputs].astype(jnp.float32)
    value = out[:, num_outputs:head_width].astype(jnp.float32)
    return action, value


# ------------------------------------------------------------------- setup ----
def init_params(key, obs_size, num_outputs, encoding_size=8,
                arch_encoder=(200, 500), arch_decoder=(500, 200)):
    """Deterministic synthetic init (uniform, PyTorch-Linear-like scale)."""
    def linear(key, fan_in, fan_out):
        kw, kb = jax.random.split(key)
        bound = 1.0 / jnp.sqrt(jnp.float32(fan_in))
        wgt = jax.random.uniform(kw, (fan_in, fan_out), jnp.float32, -bound, bound)
        bias = jax.random.uniform(kb, (1, fan_out), jnp.float32, -bound, bound)
        return wgt, bias

    enc = list(arch_encoder) + [encoding_size]      # [200, 500, 8]
    dec = list(arch_decoder)                        # [500, 200]
    keys = jax.random.split(key, 7)

    p = {}
    p["we0"], p["be0"] = linear(keys[0], obs_size, enc[0])
    p["we1"], p["be1"] = linear(keys[1], enc[0], enc[1])
    p["we2"], p["be2"] = linear(keys[2], enc[1], enc[2])
    p["wd0"], p["bd0"] = linear(keys[3], encoding_size, dec[0])
    p["wd1"], p["bd1"] = linear(keys[4], dec[0], dec[1])
    p["wa"],  p["ba"]  = linear(keys[5], dec[1], num_outputs)
    p["wc"],  p["bc"]  = linear(keys[6], dec[1], 1)
    return p


def _reference(obs, p):
    relu = lambda x: jnp.maximum(x, 0.0)
    h = relu(obs @ p["we0"] + p["be0"])
    h = relu(h @ p["we1"] + p["be1"])
    g = h @ p["we2"] + p["be2"]
    d = relu(g @ p["wd0"] + p["bd0"])
    d = relu(d @ p["wd1"] + p["bd1"])
    a = relu(d @ p["wa"] + p["ba"])
    v = relu(d @ p["wc"] + p["bc"])
    return a, v


if __name__ == "__main__":
    key = jax.random.PRNGKey(0)
    k_obs, k_par = jax.random.split(key)

    batch, obs_size, num_outputs = 16, 32, 4
    obs = jax.random.normal(k_obs, (batch, obs_size), jnp.float32)
    params = init_params(k_par, obs_size, num_outputs)

    a_ref, v_ref = _reference(obs, params)

    # Exact-precision path (f32 weights, f32 output): tight semantic check.
    prepped32 = prepare_params(params, use_bf16=False)
    a32, v32 = gnae_forward(obs, prepped32)
    jax.block_until_ready((a32, v32))
    assert a32.shape == (batch, num_outputs) and v32.shape == (batch, 1)
    assert jnp.allclose(a32, a_ref, atol=1e-4, rtol=1e-4)
    assert jnp.allclose(v32, v_ref, atol=1e-4, rtol=1e-4)

    # Performance path: bf16 weights/activations/output with f32 accumulation.
    prepped = prepare_params(params, use_bf16=True)
    action, value = gnae_forward(obs, prepped)
    jax.block_until_ready((action, value))
    assert action.shape == (batch, num_outputs) and value.shape == (batch, 1)
    assert jnp.allclose(action, a_ref, atol=5e-2, rtol=5e-2)
    assert jnp.allclose(value, v_ref, atol=5e-2, rtol=5e-2)

    # forward() of the module returns (action, []); value_function() reshapes value to [-1]
    _forward_out = (action, [])
    _value_fn_out = value.reshape(-1)

    print("KERNEL_OK")
</pallas_src>

<mosaic_0001>
module attributes {stable_mosaic.version = 11 : i64} {
  func.func @_gnae_kernel(%arg0: i32, %arg1: memref<16x32xf32, #tpu.memory_space<vmem>>, %arg2: memref<32x256xf32, #tpu.memory_space<vmem>>, %arg3: memref<1x256xf32, #tpu.memory_space<vmem>>, %arg4: memref<256x512xf32, #tpu.memory_space<vmem>>, %arg5: memref<1x512xf32, #tpu.memory_space<vmem>>, %arg6: memref<512x128xf32, #tpu.memory_space<vmem>>, %arg7: memref<1x128xf32, #tpu.memory_space<vmem>>, %arg8: memref<128x512xf32, #tpu.memory_space<vmem>>, %arg9: memref<1x512xf32, #tpu.memory_space<vmem>>, %arg10: memref<512x256xf32, #tpu.memory_space<vmem>>, %arg11: memref<1x256xf32, #tpu.memory_space<vmem>>, %arg12: memref<256x128xf32, #tpu.memory_space<vmem>>, %arg13: memref<1x128xf32, #tpu.memory_space<vmem>>, %arg14: memref<16x128xf32, #tpu.memory_space<vmem>>) attributes {dimension_semantics = [#tpu.dimension_semantics<parallel>], iteration_bounds = array<i64: 1>, scalar_prefetch = 0 : i64, scratch_operands = 0 : i64, tpu.core_type = #tpu.core_type<tc>, window_params = [{transform_indices = @transform_0, window_bounds = array<i64: 16, 32>}, {pipeline_mode = #tpu.pipeline_mode<synchronous>, transform_indices = @transform_1, window_bounds = array<i64: 32, 256>}, {pipeline_mode = #tpu.pipeline_mode<synchronous>, transform_indices = @transform_2, window_bounds = array<i64: 1, 256>}, {pipeline_mode = #tpu.pipeline_mode<synchronous>, transform_indices = @transform_3, window_bounds = array<i64: 256, 512>}, {pipeline_mode = #tpu.pipeline_mode<synchronous>, transform_indices = @transform_4, window_bounds = array<i64: 1, 512>}, {pipeline_mode = #tpu.pipeline_mode<synchronous>, transform_indices = @transform_5, window_bounds = array<i64: 512, 128>}, {pipeline_mode = #tpu.pipeline_mode<synchronous>, transform_indices = @transform_6, window_bounds = array<i64: 1, 128>}, {pipeline_mode = #tpu.pipeline_mode<synchronous>, transform_indices = @transform_7, window_bounds = array<i64: 128, 512>}, {pipeline_mode = #tpu.pipeline_mode<synchronous>, transform_indices = @transform_8, window_bounds = array<i64: 1, 512>}, {pipeline_mode = #tpu.pipeline_mode<synchronous>, transform_indices = @transform_9, window_bounds = array<i64: 512, 256>}, {pipeline_mode = #tpu.pipeline_mode<synchronous>, transform_indices = @transform_10, window_bounds = array<i64: 1, 256>}, {pipeline_mode = #tpu.pipeline_mode<synchronous>, transform_indices = @transform_11, window_bounds = array<i64: 256, 128>}, {pipeline_mode = #tpu.pipeline_mode<synchronous>, transform_indices = @transform_12, window_bounds = array<i64: 1, 128>}, {transform_indices = @transform_13, window_bounds = array<i64: 16, 128>}]} {
    %c0 = arith.constant 0 : index
    %c0_0 = arith.constant 0 : index
    %0 = vector.load %arg1[%c0, %c0_0] : memref<16x32xf32, #tpu.memory_space<vmem>>, vector<16x32xf32>
    %c0_1 = arith.constant 0 : index
    %c0_2 = arith.constant 0 : index
    %1 = vector.load %arg2[%c0_1, %c0_2] : memref<32x256xf32, #tpu.memory_space<vmem>>, vector<32x256xf32>
    %cst = arith.constant dense<0.000000e+00> : vector<16x256xf32>
    %2 = tpu.matmul %0, %1, %cst {dimension_numbers = #tpu.dot_dimension_numbers<[1], [0], [0], [1], [0, 0, 1, 1], [], []>} : vector<16x32xf32>, vector<32x256xf32>, vector<16x256xf32> -> vector<16x256xf32>
    %c0_3 = arith.constant 0 : index
    %c0_4 = arith.constant 0 : index
    %3 = vector.load %arg3[%c0_3, %c0_4] : memref<1x256xf32, #tpu.memory_space<vmem>>, vector<1x256xf32>
    %4 = vector.broadcast %3 : vector<1x256xf32> to vector<16x256xf32>
    %5 = arith.addf %2, %4 : vector<16x256xf32>
    %cst_5 = arith.constant 0.000000e+00 : f32
    %6 = vector.broadcast %cst_5 : f32 to vector<16x256xf32>
    %7 = arith.maximumf %5, %6 : vector<16x256xf32>
    %c0_6 = arith.constant 0 : index
    %c0_7 = arith.constant 0 : index
    %8 = vector.load %arg4[%c0_6, %c0_7] : memref<256x512xf32, #tpu.memory_space<vmem>>, vector<256x512xf32>
    %cst_8 = arith.constant dense<0.000000e+00> : vector<16x512xf32>
    %9 = tpu.matmul %7, %8, %cst_8 {dimension_numbers = #tpu.dot_dimension_numbers<[1], [0], [0], [1], [0, 0, 1, 1], [], []>} : vector<16x256xf32>, vector<256x512xf32>, vector<16x512xf32> -> vector<16x512xf32>
    %c0_9 = arith.constant 0 : index
    %c0_10 = arith.constant 0 : index
    %10 = vector.load %arg5[%c0_9, %c0_10] : memref<1x512xf32, #tpu.memory_space<vmem>>, vector<1x512xf32>
    %11 = vector.broadcast %10 : vector<1x512xf32> to vector<16x512xf32>
    %12 = arith.addf %9, %11 : vector<16x512xf32>
    %cst_11 = arith.constant 0.000000e+00 : f32
    %13 = vector.broadcast %cst_11 : f32 to vector<16x512xf32>
    %14 = arith.maximumf %12, %13 : vector<16x512xf32>
    %c0_12 = arith.constant 0 : index
    %c0_13 = arith.constant 0 : index
    %15 = vector.load %arg6[%c0_12, %c0_13] : memref<512x128xf32, #tpu.memory_space<vmem>>, vector<512x128xf32>
    %cst_14 = arith.constant dense<0.000000e+00> : vector<16x128xf32>
    %16 = tpu.matmul %14, %15, %cst_14 {dimension_numbers = #tpu.dot_dimension_numbers<[1], [0], [0], [1], [0, 0, 1, 1], [], []>} : vector<16x512xf32>, vector<512x128xf32>, vector<16x128xf32> -> vector<16x128xf32>
    %c0_15 = arith.constant 0 : index
    %c0_16 = arith.constant 0 : index
    %17 = vector.load %arg7[%c0_15, %c0_16] : memref<1x128xf32, #tpu.memory_space<vmem>>, vector<1x128xf32>
    %18 = vector.broadcast %17 : vector<1x128xf32> to vector<16x128xf32>
    %19 = arith.addf %16, %18 : vector<16x128xf32>
    %c0_17 = arith.constant 0 : index
    %c0_18 = arith.constant 0 : index
    %20 = vector.load %arg8[%c0_17, %c0_18] : memref<128x512xf32, #tpu.memory_space<vmem>>, vector<128x512xf32>
    %cst_19 = arith.constant dense<0.000000e+00> : vector<16x512xf32>
    %21 = tpu.matmul %19, %20, %cst_19 {dimension_numbers = #tpu.dot_dimension_numbers<[1], [0], [0], [1], [0, 0, 1, 1], [], []>} : vector<16x128xf32>, vector<128x512xf32>, vector<16x512xf32> -> vector<16x512xf32>
    %c0_20 = arith.constant 0 : index
    %c0_21 = arith.constant 0 : index
    %22 = vector.load %arg9[%c0_20, %c0_21] : memref<1x512xf32, #tpu.memory_space<vmem>>, vector<1x512xf32>
    %23 = vector.broadcast %22 : vector<1x512xf32> to vector<16x512xf32>
    %24 = arith.addf %21, %23 : vector<16x512xf32>
    %cst_22 = arith.constant 0.000000e+00 : f32
    %25 = vector.broadcast %cst_22 : f32 to vector<16x512xf32>
    %26 = arith.maximumf %24, %25 : vector<16x512xf32>
    %c0_23 = arith.constant 0 : index
    %c0_24 = arith.constant 0 : index
    %27 = vector.load %arg10[%c0_23, %c0_24] : memref<512x256xf32, #tpu.memory_space<vmem>>, vector<512x256xf32>
    %cst_25 = arith.constant dense<0.000000e+00> : vector<16x256xf32>
    %28 = tpu.matmul %26, %27, %cst_25 {dimension_numbers = #tpu.dot_dimension_numbers<[1], [0], [0], [1], [0, 0, 1, 1], [], []>} : vector<16x512xf32>, vector<512x256xf32>, vector<16x256xf32> -> vector<16x256xf32>
    %c0_26 = arith.constant 0 : index
    %c0_27 = arith.constant 0 : index
    %29 = vector.load %arg11[%c0_26, %c0_27] : memref<1x256xf32, #tpu.memory_space<vmem>>, vector<1x256xf32>
    %30 = vector.broadcast %29 : vector<1x256xf32> to vector<16x256xf32>
    %31 = arith.addf %28, %30 : vector<16x256xf32>
    %cst_28 = arith.constant 0.000000e+00 : f32
    %32 = vector.broadcast %cst_28 : f32 to vector<16x256xf32>
    %33 = arith.maximumf %31, %32 : vector<16x256xf32>
    %c0_29 = arith.constant 0 : index
    %c0_30 = arith.constant 0 : index
    %34 = vector.load %arg12[%c0_29, %c0_30] : memref<256x128xf32, #tpu.memory_space<vmem>>, vector<256x128xf32>
    %cst_31 = arith.constant dense<0.000000e+00> : vector<16x128xf32>
    %35 = tpu.matmul %33, %34, %cst_31 {dimension_numbers = #tpu.dot_dimension_numbers<[1], [0], [0], [1], [0, 0, 1, 1], [], []>} : vector<16x256xf32>, vector<256x128xf32>, vector<16x128xf32> -> vector<16x128xf32>
    %c0_32 = arith.constant 0 : index
    %c0_33 = arith.constant 0 : index
    %36 = vector.load %arg13[%c0_32, %c0_33] : memref<1x128xf32, #tpu.memory_space<vmem>>, vector<1x128xf32>
    %37 = vector.broadcast %36 : vector<1x128xf32> to vector<16x128xf32>
    %38 = arith.addf %35, %37 : vector<16x128xf32>
    %cst_34 = arith.constant 0.000000e+00 : f32
    %39 = vector.broadcast %cst_34 : f32 to vector<16x128xf32>
    %40 = arith.maximumf %38, %39 : vector<16x128xf32>
    %c0_35 = arith.constant 0 : index
    %c0_36 = arith.constant 0 : index
    %41 = vector.load %arg14[%c0_35, %c0_36] : memref<16x128xf32, #tpu.memory_space<vmem>>, vector<16x128xf32>
    tpu.vector_store %arg14[%c0_35, %c0_36], %40 {strides = array<i32>} : memref<16x128xf32, #tpu.memory_space<vmem>>, vector<16x128xf32>,
    return
  }
  func.func @transform_0(%arg0: i32) -> (i32, i32) {
    %c0_i32 = arith.constant 0 : i32
    %c0_i32_0 = arith.constant 0 : i32
    return %arg0, %c0_i32 : i32, i32
  }
  func.func @transform_1(%arg0: i32) -> (i32, i32) {
    %c0_i32 = arith.constant 0 : i32
    %c0_i32_0 = arith.constant 0 : i32
    %c0_i32_1 = arith.constant 0 : i32
    return %c0_i32, %c0_i32_0 : i32, i32
  }
  func.func @transform_2(%arg0: i32) -> (i32, i32) {
    %c0_i32 = arith.constant 0 : i32
    %c0_i32_0 = arith.constant 0 : i32
    %c0_i32_1 = arith.constant 0 : i32
    return %c0_i32, %c0_i32_0 : i32, i32
  }
  func.func @transform_3(%arg0: i32) -> (i32, i32) {
    %c0_i32 = arith.constant 0 : i32
    %c0_i32_0 = arith.constant 0 : i32
    %c0_i32_1 = arith.constant 0 : i32
    return %c0_i32, %c0_i32_0 : i32, i32
  }
  func.func @transform_4(%arg0: i32) -> (i32, i32) {
    %c0_i32 = arith.constant 0 : i32
    %c0_i32_0 = arith.constant 0 : i32
    %c0_i32_1 = arith.constant 0 : i32
    return %c0_i32, %c0_i32_0 : i32, i32
  }
  func.func @transform_5(%arg0: i32) -> (i32, i32) {
    %c0_i32 = arith.constant 0 : i32
    %c0_i32_0 = arith.constant 0 : i32
    %c0_i32_1 = arith.constant 0 : i32
    return %c0_i32, %c0_i32_0 : i32, i32
  }
  func.func @transform_6(%arg0: i32) -> (i32, i32) {
    %c0_i32 = arith.constant 0 : i32
    %c0_i32_0 = arith.constant 0 : i32
    %c0_i32_1 = arith.constant 0 : i32
    return %c0_i32, %c0_i32_0 : i32, i32
  }
  func.func @transform_7(%arg0: i32) -> (i32, i32) {
    %c0_i32 = arith.constant 0 : i32
    %c0_i32_0 = arith.constant 0 : i32
    %c0_i32_1 = arith.constant 0 : i32
    return %c0_i32, %c0_i32_0 : i32, i32
  }
  func.func @transform_8(%arg0: i32) -> (i32, i32) {
    %c0_i32 = arith.constant 0 : i32
    %c0_i32_0 = arith.constant 0 : i32
    %c0_i32_1 = arith.constant 0 : i32
    return %c0_i32, %c0_i32_0 : i32, i32
  }
  func.func @transform_9(%arg0: i32) -> (i32, i32) {
    %c0_i32 = arith.constant 0 : i32
    %c0_i32_0 = arith.constant 0 : i32
    %c0_i32_1 = arith.constant 0 : i32
    return %c0_i32, %c0_i32_0 : i32, i32
  }
  func.func @transform_10(%arg0: i32) -> (i32, i32) {
    %c0_i32 = arith.constant 0 : i32
    %c0_i32_0 = arith.constant 0 : i32
    %c0_i32_1 = arith.constant 0 : i32
    return %c0_i32, %c0_i32_0 : i32, i32
  }
  func.func @transform_11(%arg0: i32) -> (i32, i32) {
    %c0_i32 = arith.constant 0 : i32
    %c0_i32_0 = arith.constant 0 : i32
    %c0_i32_1 = arith.constant 0 : i32
    return %c0_i32, %c0_i32_0 : i32, i32
  }
  func.func @transform_12(%arg0: i32) -> (i32, i32) {
    %c0_i32 = arith.constant 0 : i32
    %c0_i32_0 = arith.constant 0 : i32
    %c0_i32_1 = arith.constant 0 : i32
    return %c0_i32, %c0_i32_0 : i32, i32
  }
  func.func @transform_13(%arg0: i32) -> (i32, i32) {
    %c0_i32 = arith.constant 0 : i32
    %c0_i32_0 = arith.constant 0 : i32
    return %arg0, %c0_i32 : i32, i32
  }
}

</mosaic_0001>

<bundles_post_ra>
// kernel: tpu_custom_call.1
= control target key start
LH: loop header
LB: loop body
LE: loop exit
PB: predicated region body
PF: predicated region fallthrough
CT: control target
= control target key end

     0   :  { %18 = vsyncpa [#allocation3], 0  ;;  %s1779_s0 = inlined_call_operand.hbm [shape: f32[16,32], index: 0, kind: input, shape index: {}]   ;;  %s1780_s1 = inlined_call_operand.hbm [shape: f32[32,256], index: 1, kind: input, shape index: {}]   ;;  %s1781_s2 = inlined_call_operand.hbm [shape: f32[1,256], index: 2, kind: input, shape index: {}]   ;;  %s1782_s3 = inlined_call_operand.hbm [shape: f32[256,512], index: 3, kind: input, shape index: {}]   ;;  %s1783_s4 = inlined_call_operand.hbm [shape: f32[1,512], index: 4, kind: input, shape index: {}]   ;;  %s1784_s5 = inlined_call_operand.hbm [shape: f32[512,128], index: 5, kind: input, shape index: {}]   ;;  %s1785_s6 = inlined_call_operand.vmem [shape: f32[1,128], index: 6, kind: input, shape index: {}]   ;;  %s1786_s7 = inlined_call_operand.hbm [shape: f32[128,512], index: 7, kind: input, shape index: {}]   ;;  %s1787_s8 = inlined_call_operand.vmem [shape: f32[1,512], index: 8, kind: input, shape index: {}]   ;;  %s1788_s9 = inlined_call_operand.hbm [shape: f32[512,256], index: 9, kind: input, shape index: {}]   ;;  %s1789_s10 = inlined_call_operand.vmem [shape: f32[1,256], index: 10, kind: input, shape index: {}]   ;;  %s1790_s11 = inlined_call_operand.hbm [shape: f32[256,128], index: 11, kind: input, shape index: {}]   ;;  %s1791_s12 = inlined_call_operand.vmem [shape: f32[1,128], index: 12, kind: input, shape index: {}]   ;;  %s1792_s13 = inlined_call_operand.hbm [shape: f32[16,128], index: 13, kind: output, shape index: {}]  }
   0x1   :  { %19 = vsyncpa [#allocation6], 0 }
   0x2   :  { %20 = vsyncpa [#allocation9], 0 }
   0x3   :  { %21 = vsyncpa [#allocation12], 0 }
   0x4   :  { %22 = vsyncpa [#allocation15], 0  ;;  %s41_s27 = sshll.u32 %s1780_s1, 4  ;;  %s42_s27 = int_to_ptr.hbm [resolvable:$true] %s41_s27 }
   0x5   :  { %23 = vsyncpa [#allocation4], 0  ;;  %s1623_s28 = smov [#allocation5]   ;;  %s65_s15 = sshll.u32 %s1782_s3, 4  ;;  %s66_s15 = int_to_ptr.hbm [resolvable:$true] %s65_s15 }
   0x6   :  { %s43_s29 = sshll.u32 %s1623_s28, 4  ;;  %s1624_s16 = smov 256   ;;  %s44_s29 = int_to_ptr.vmem [resolvable:$true] %s43_s29 }
   0x7   :  { %s1625_s17 = smov 16   ;;  %s1626_s18 = smov [#allocation8]  }
   0x8   :  { %49 = dma.hbm_to_vmem [thread:$0]  %s42_s27, 1024, %s44_s29, [#allocation6], %s1624_s16, %s1624_s16, %s1625_s17  }
   0x9   :  { %s67_s19 = sshll.u32 %s1626_s18, 4  ;;  %s1627_s20 = smov 512   ;;  %s68_s19 = int_to_ptr.vmem [resolvable:$true] %s67_s19 }
   0xa   :  { %s1628_s21 = smov 32   ;;  %s89_s23 = sshll.u32 %s1784_s5, 4  ;;  %s90_s23 = int_to_ptr.hbm [resolvable:$true] %s89_s23 }
   0xb   :  { %73 = dma.hbm_to_vmem [thread:$0]  %s66_s15, 16384, %s68_s19, [#allocation9], %s1627_s20, %s1627_s20, %s1628_s21  }
   0xc   :  { %s1629_s24 = smov [#allocation11]   ;;  %s119_s27 = sshll.u32 %s1788_s9, 4  ;;  %s120_s27 = int_to_ptr.hbm [resolvable:$true] %s119_s27 }
   0xd   :  { %s91_s3 = sshll.u32 %s1629_s24, 4  ;;  %s1630_s28 = smov 128   ;;  %s92_s3 = int_to_ptr.vmem [resolvable:$true] %s91_s3 }
   0xe   :  { %s1631_s29 = smov 8   ;;  %s1632_s30 = smov [#allocation14]  }
   0xf   :  { %97 = dma.hbm_to_vmem [thread:$0]  %s90_s23, 8192, %s92_s3, [#allocation12], %s1630_s28, %s1630_s28, %s1631_s29  }
  0x10   :  { %s121_s14 = sshll.u32 %s1632_s30, 4  ;;  %s28_s5 = sshll.u32 %s1779_s0, 4  ;;  %s122_s14 = int_to_ptr.vmem [resolvable:$true] %s121_s14  ;;  %s29_s5 = int_to_ptr.hbm [resolvable:$true] %s28_s5 }
  0x11   :  { %127 = dma.hbm_to_vmem [thread:$0]  %s120_s27, 16384, %s122_s14, [#allocation15], %s1624_s16, %s1624_s16, %s1625_s17  }
  0x12   :  { %s55_s9 = sshll.u32 %s1781_s2, 4  ;;  %s1633_s22 = smov [#allocation2]   ;;  %s56_s9 = int_to_ptr.hbm [resolvable:$true] %s55_s9 }
  0x13   :  { %s30_s24 = sshll.u32 %s1633_s22, 4  ;;  %s1634_s23 = smov [#allocation7]   ;;  %s31_s24 = int_to_ptr.vmem [resolvable:$true] %s30_s24 }
  0x14   :  { %36 = dma.hbm_to_vmem [thread:$0]  %s29_s5, 256, %s31_s24, [#allocation3], %s1630_s28, %s1630_s28, %s1631_s29  }
  0x15   :  { %s57_s3 = sshll.u32 %s1634_s23, 4  ;;  %s79_s0 = sshll.u32 %s1783_s4, 4  ;;  %s58_s3 = int_to_ptr.vmem [resolvable:$true] %s57_s3  ;;  %s80_s0 = int_to_ptr.hbm [resolvable:$true] %s79_s0 }
  0x16   :  { %60 = dma.hbm_to_vmem [thread:$0]  %s56_s9, 32, %s58_s3, [#allocation6]  }
  0x17   :  { %s104_s2 = sshll.u32 %s1786_s7, 4  ;;  %s1635_s27 = smov [#allocation10]   ;;  %s105_s2 = int_to_ptr.hbm [resolvable:$true] %s104_s2 }
  0x18   :  { %s81_s30 = sshll.u32 %s1635_s27, 4  ;;  %s1636_s14 = smov [#allocation13]   ;;  %s82_s30 = int_to_ptr.vmem [resolvable:$true] %s81_s30 }
  0x19   :  { %84 = dma.hbm_to_vmem [thread:$0]  %s80_s0, 64, %s82_s30, [#allocation9]  }
  0x1a   :  { %s106_s15 = sshll.u32 %s1636_s14, 4  ;;  %s134_s19 = sshll.u32 %s1790_s11, 4  ;;  %s107_s15 = int_to_ptr.vmem [resolvable:$true] %s106_s15  ;;  %s135_s19 = int_to_ptr.hbm [resolvable:$true] %s134_s19 }
  0x1b   :  { %112 = dma.hbm_to_vmem [thread:$0]  %s105_s2, 8192, %s107_s15, [#allocation12], %s1627_s20, %s1627_s20, %s1628_s21  }
  0x1c   :  { %s1637_s4 = smov [#allocation16]  }
  0x1d   :  { %s136_s1 = sshll.u32 %s1637_s4, 4  ;;  %s137_s1 = int_to_ptr.vmem [resolvable:$true] %s136_s1 }
  0x1e   :  { %142 = dma.hbm_to_vmem [thread:$0]  %s135_s19, 4096, %s137_s1, [#allocation15], %s1630_s28, %s1630_s28, %s1631_s29  }
  0x1f   :  { %1611 = dma.done.wait [#allocation3], 256  }
  0x20   :  { %1612 = vsyncadd [#allocation3], 4294967040 }
  0x21   :  { %1613 = dma.done.wait [#allocation6], 1056  }
  0x22   :  { %1614 = vsyncadd [#allocation6], 4294966240 }
  0x23   :  { %1615 = dma.done.wait [#allocation9], 16448  }
  0x24   :  { %1616 = vsyncadd [#allocation9], 4294950848 }
  0x25   :  { %1617 = dma.done.wait [#allocation12], 16384  }
  0x26   :  { %1618 = vsyncadd [#allocation12], 4294950912 }
  0x27   :  { %1619 = dma.done.wait [#allocation15], 20480  }
  0x28   :  { %1620 = vsyncadd [#allocation15], 4294946816  ;;  %v189_v0 = vld [vmem:[#allocation5 + $0x30] sm:$0xff]  ;;  %v190_v1 = vld [vmem:[#allocation5 + $0x38] sm:$0xff]  ;;  %vm197_vm0 = vcmask 261120   ;;  %s1638_s22 = smov [#allocation17]  }
  0x29   :  { %v187_v2 = vld [vmem:[#allocation5 + $0x20] sm:$0xff]  ;;  %216 = vmatpush.msra.mxu0 %v189_v0  ;;  %239 = vmatpush.msra.mxu1 %v190_v1  ;;  %v188_v3 = vld [vmem:[#allocation5 + $0x28] sm:$0xff]  ;;  %v185_v4 = vld [vmem:[#allocation5 + $0x10] sm:$0xff]  ;;  %s1330_s24 = sshll.u32 %s1638_s22, 4  ;;  %s1332_s25 = sshll.u32 %s1792_s13, 4  ;;  %s1331_s24 = int_to_ptr.vmem [resolvable:$true] %s1330_s24  ;;  %s1333_s25 = int_to_ptr.hbm [resolvable:$true] %s1332_s25 }
  0x2a   :  { %v186_v5 = vld [vmem:[#allocation5 + $0x18] sm:$0xff]  ;;  %v314_v6 = vld [vmem:[#allocation8 + $0x1e0] sm:$0xff]  ;;  %v181_v11 = vld [vmem:[#allocation2] sm:$0xff] }
  0x2b   :  { %217 = vmatpush.msra.mxu0 %v187_v2  ;;  %240 = vmatpush.msra.mxu1 %v188_v3  ;;  %v378_v7 = vld [vmem:[#allocation8 + $0x3e0] sm:$0xff]  ;;  %v315_v13 = vld [vmem:[#allocation8 + $0x1e8] sm:$0xff]  ;;  %v182_v27 = vld [vmem:[#allocation2 + $0x8] sm:$0xff] }
  0x2c   :  { %v183_v8 = vld [vmem:[#allocation5] sm:$0xff]  ;;  %v184_v9 = vld [vmem:[#allocation5 + $0x8] sm:$0xff]  ;;  %392 = vmatpush.msra.mxu2 %v314_v6  ;;  %415 = vmatpush.msra.mxu3 %v378_v7 }
  0x2d   :  { %v310_v10 = vld [vmem:[#allocation8 + $0x1c0] sm:$0xff]  ;;  %218 = vmatpush.msra.mxu0 %v185_v4  ;;  %241 = vmatpush.msra.mxu1 %v186_v5  ;;  %v379_v14 = vld [vmem:[#allocation8 + $0x3e8] sm:$0xff] }
  0x2e   :  { %v374_v12 = vld [vmem:[#allocation8 + $0x3c0] sm:$0xff]  ;;  %393 = vmatpush.msra.mxu2 %v310_v10  ;;  %v311_v17 = vld [vmem:[#allocation8 + $0x1c8] sm:$0xff]  ;;  %v316_v10 = vld [vmem:[#allocation8 + $0x1f0] sm:$0xff] }
  0x2f   :  { %416 = vmatpush.msra.mxu3 %v374_v12  ;;  %219 = vmatpush.msra.mxu0 %v183_v8  ;;  %v306_v15 = vld [vmem:[#allocation8 + $0x1a0] sm:$0xff]  ;;  %v375_v18 = vld [vmem:[#allocation8 + $0x3c8] sm:$0xff]  ;;  %v317_v12 = vld [vmem:[#allocation8 + $0x1f8] sm:$0xff] }
  0x30   :  { %242 = vmatpush.msra.mxu1 %v184_v9  ;;  %v370_v16 = vld [vmem:[#allocation8 + $0x3a0] sm:$0xff]  ;;  %1349 = vmatmul.msk.f32.vlgmr.msra.gmra.mxu0 %vm197_vm0, %v181_v11  ;;  %v307_v21 = vld [vmem:[#allocation8 + $0x1a8] sm:$0xff] }
  0x31   :  { %1351 = vmatmul.msk.f32.vlgmr.msra.gmra.mxu1 %vm197_vm0, %v181_v11  ;;  %438 = vmatpush.msrb.mxu0 %v315_v13  ;;  %v302_v19 = vld [vmem:[#allocation8 + $0x180] sm:$0xff]  ;;  %v371_v22 = vld [vmem:[#allocation8 + $0x3a8] sm:$0xff]  ;;  %v380_v11 = vld [vmem:[#allocation8 + $0x3f0] sm:$0xff] }
  0x32   :  { %461 = vmatpush.msrb.mxu1 %v379_v14  ;;  %v366_v20 = vld [vmem:[#allocation8 + $0x380] sm:$0xff]  ;;  %394 = vmatpush.msra.mxu2 %v306_v15  ;;  %v303_v25 = vld [vmem:[#allocation8 + $0x188] sm:$0xff]  ;;  %v381_v13 = vld [vmem:[#allocation8 + $0x3f8] sm:$0xff] }
  0x33   :  { %417 = vmatpush.msra.mxu3 %v370_v16  ;;  %439 = vmatpush.msrb.mxu0 %v311_v17  ;;  %v298_v23 = vld [vmem:[#allocation8 + $0x160] sm:$0xff]  ;;  %v367_v26 = vld [vmem:[#allocation8 + $0x388] sm:$0xff]  ;;  %v312_v14 = vld [vmem:[#allocation8 + $0x1d0] sm:$0xff] }
  0x34   :  { %462 = vmatpush.msrb.mxu1 %v375_v18  ;;  %v362_v24 = vld [vmem:[#allocation8 + $0x360] sm:$0xff]  ;;  %395 = vmatpush.msra.mxu2 %v302_v19  ;;  %v299_v28 = vld [vmem:[#allocation8 + $0x168] sm:$0xff]  ;;  %v376_v15 = vld [vmem:[#allocation8 + $0x3d0] sm:$0xff] }
  0x35   :  { %418 = vmatpush.msra.mxu3 %v366_v20  ;;  %440 = vmatpush.msrb.mxu0 %v307_v21  ;;  %v363_v29 = vld [vmem:[#allocation8 + $0x368] sm:$0xff]  ;;  %v294_v30 = vld [vmem:[#allocation8 + $0x140] sm:$0xff]  ;;  %v313_v16 = vld [vmem:[#allocation8 + $0x1d8] sm:$0xff] }
  0x36   :  { %463 = vmatpush.msrb.mxu1 %v371_v22  ;;  %396 = vmatpush.msra.mxu2 %v298_v23  ;;  %v358_v31 = vld [vmem:[#allocation8 + $0x340] sm:$0xff]  ;;  %v295_v32 = vld [vmem:[#allocation8 + $0x148] sm:$0xff]  ;;  %v377_v17 = vld [vmem:[#allocation8 + $0x3d8] sm:$0xff] }
  0x37   :  { %419 = vmatpush.msra.mxu3 %v362_v24  ;;  %441 = vmatpush.msrb.mxu0 %v303_v25  ;;  %v359_v33 = vld [vmem:[#allocation8 + $0x348] sm:$0xff]  ;;  %v290_v34 = vld [vmem:[#allocation8 + $0x120] sm:$0xff]  ;;  %v308_v18 = vld [vmem:[#allocation8 + $0x1b0] sm:$0xff] }
  0x38   :  { %464 = vmatpush.msrb.mxu1 %v367_v26  ;;  %1350 = vmatmul.msk.f32.gmra.mxu0 %vm197_vm0, %v182_v27  ;;  %v354_v35 = vld [vmem:[#allocation8 + $0x320] sm:$0xff]  ;;  %v291_v36 = vld [vmem:[#allocation8 + $0x128] sm:$0xff]  ;;  %v372_v19 = vld [vmem:[#allocation8 + $0x3b0] sm:$0xff] }
  0x39   :  { %1352 = vmatmul.msk.f32.gmra.mxu1 %vm197_vm0, %v182_v27  ;;  %442 = vmatpush.msrb.mxu0 %v299_v28  ;;  %v355_v37 = vld [vmem:[#allocation8 + $0x328] sm:$0xff]  ;;  %v286_v38 = vld [vmem:[#allocation8 + $0x100] sm:$0xff]  ;;  %v309_v20 = vld [vmem:[#allocation8 + $0x1b8] sm:$0xff] }
  0x3a   :  { %465 = vmatpush.msrb.mxu1 %v363_v29  ;;  %397 = vmatpush.msra.mxu2 %v294_v30  ;;  %v350_v39 = vld [vmem:[#allocation8 + $0x300] sm:$0xff]  ;;  %v287_v40 = vld [vmem:[#allocation8 + $0x108] sm:$0xff]  ;;  %v373_v21 = vld [vmem:[#allocation8 + $0x3b8] sm:$0xff] }
  0x3b   :  { %420 = vmatpush.msra.mxu3 %v358_v31  ;;  %443 = vmatpush.msrb.mxu0 %v295_v32  ;;  %v351_v41 = vld [vmem:[#allocation8 + $0x308] sm:$0xff]  ;;  %v282_v42 = vld [vmem:[#allocation8 + $0xe0] sm:$0xff]  ;;  %v304_v22 = vld [vmem:[#allocation8 + $0x190] sm:$0xff] }
  0x3c   :  { %466 = vmatpush.msrb.mxu1 %v359_v33  ;;  %398 = vmatpush.msra.mxu2 %v290_v34  ;;  %v346_v43 = vld [vmem:[#allocation8 + $0x2e0] sm:$0xff]  ;;  %v283_v44 = vld [vmem:[#allocation8 + $0xe8] sm:$0xff]  ;;  %v368_v23 = vld [vmem:[#allocation8 + $0x390] sm:$0xff] }
  0x3d   :  { %421 = vmatpush.msra.mxu3 %v354_v35  ;;  %444 = vmatpush.msrb.mxu0 %v291_v36  ;;  %v347_v45 = vld [vmem:[#allocation8 + $0x2e8] sm:$0xff]  ;;  %v278_v46 = vld [vmem:[#allocation8 + $0xc0] sm:$0xff]  ;;  %v305_v24 = vld [vmem:[#allocation8 + $0x198] sm:$0xff] }
  0x3e   :  { %467 = vmatpush.msrb.mxu1 %v355_v37  ;;  %399 = vmatpush.msra.mxu2 %v286_v38  ;;  %v342_v47 = vld [vmem:[#allocation8 + $0x2c0] sm:$0xff]  ;;  %v279_v48 = vld [vmem:[#allocation8 + $0xc8] sm:$0xff]  ;;  %v369_v25 = vld [vmem:[#allocation8 + $0x398] sm:$0xff] }
  0x3f   :  { %422 = vmatpush.msra.mxu3 %v350_v39  ;;  %445 = vmatpush.msrb.mxu0 %v287_v40  ;;  %v343_v49 = vld [vmem:[#allocation8 + $0x2c8] sm:$0xff]  ;;  %v274_v50 = vld [vmem:[#allocation8 + $0xa0] sm:$0xff]  ;;  %v300_v26 = vld [vmem:[#allocation8 + $0x170] sm:$0xff] }
  0x40   :  { %468 = vmatpush.msrb.mxu1 %v351_v41  ;;  %400 = vmatpush.msra.mxu2 %v282_v42  ;;  %v338_v51 = vld [vmem:[#allocation8 + $0x2a0] sm:$0xff]  ;;  %v275_v52 = vld [vmem:[#allocation8 + $0xa8] sm:$0xff]  ;;  %v364_v27 = vld [vmem:[#allocation8 + $0x370] sm:$0xff] }
  0x41   :  { %423 = vmatpush.msra.mxu3 %v346_v43  ;;  %446 = vmatpush.msrb.mxu0 %v283_v44  ;;  %v339_v53 = vld [vmem:[#allocation8 + $0x2a8] sm:$0xff]  ;;  %v270_v54 = vld [vmem:[#allocation8 + $0x80] sm:$0xff]  ;;  %v301_v28 = vld [vmem:[#allocation8 + $0x178] sm:$0xff] }
  0x42   :  { %469 = vmatpush.msrb.mxu1 %v347_v45  ;;  %401 = vmatpush.msra.mxu2 %v278_v46  ;;  %v334_v55 = vld [vmem:[#allocation8 + $0x280] sm:$0xff]  ;;  %v271_v56 = vld [vmem:[#allocation8 + $0x88] sm:$0xff]  ;;  %v365_v29 = vld [vmem:[#allocation8 + $0x378] sm:$0xff] }
  0x43   :  { %424 = vmatpush.msra.mxu3 %v342_v47  ;;  %447 = vmatpush.msrb.mxu0 %v279_v48  ;;  %v335_v57 = vld [vmem:[#allocation8 + $0x288] sm:$0xff]  ;;  %v266_v58 = vld [vmem:[#allocation8 + $0x60] sm:$0xff]  ;;  %v296_v30 = vld [vmem:[#allocation8 + $0x150] sm:$0xff] }
  0x44   :  { %470 = vmatpush.msrb.mxu1 %v343_v49  ;;  %402 = vmatpush.msra.mxu2 %v274_v50  ;;  %v330_v59 = vld [vmem:[#allocation8 + $0x260] sm:$0xff]  ;;  %v267_v60 = vld [vmem:[#allocation8 + $0x68] sm:$0xff]  ;;  %v360_v31 = vld [vmem:[#allocation8 + $0x350] sm:$0xff] }
  0x45   :  { %425 = vmatpush.msra.mxu3 %v338_v51  ;;  %448 = vmatpush.msrb.mxu0 %v275_v52  ;;  %v331_v61 = vld [vmem:[#allocation8 + $0x268] sm:$0xff]  ;;  %v262_v62 = vld [vmem:[#allocation8 + $0x40] sm:$0xff]  ;;  %v297_v32 = vld [vmem:[#allocation8 + $0x158] sm:$0xff] }
  0x46   :  { %471 = vmatpush.msrb.mxu1 %v339_v53  ;;  %403 = vmatpush.msra.mxu2 %v270_v54  ;;  %v326_v63 = vld [vmem:[#allocation8 + $0x240] sm:$0xff]  ;;  %v263_v0 = vld [vmem:[#allocation8 + $0x48] sm:$0xff]  ;;  %v361_v33 = vld [vmem:[#allocation8 + $0x358] sm:$0xff] }
  0x47   :  { %426 = vmatpush.msra.mxu3 %v334_v55  ;;  %449 = vmatpush.msrb.mxu0 %v271_v56  ;;  %v327_v1 = vld [vmem:[#allocation8 + $0x248] sm:$0xff]  ;;  %v258_v2 = vld [vmem:[#allocation8 + $0x20] sm:$0xff]  ;;  %v292_v34 = vld [vmem:[#allocation8 + $0x130] sm:$0xff] }
  0x48   :  { %472 = vmatpush.msrb.mxu1 %v335_v57  ;;  %404 = vmatpush.msra.mxu2 %v266_v58  ;;  %v322_v3 = vld [vmem:[#allocation8 + $0x220] sm:$0xff]  ;;  %v259_v4 = vld [vmem:[#allocation8 + $0x28] sm:$0xff]  ;;  %v356_v35 = vld [vmem:[#allocation8 + $0x330] sm:$0xff] }
  0x49   :  { %427 = vmatpush.msra.mxu3 %v330_v59  ;;  %450 = vmatpush.msrb.mxu0 %v267_v60  ;;  %v323_v5 = vld [vmem:[#allocation8 + $0x228] sm:$0xff]  ;;  %v254_v6 = vld [vmem:[#allocation8] sm:$0xff]  ;;  %v293_v36 = vld [vmem:[#allocation8 + $0x138] sm:$0xff] }
  0x4a   :  { %473 = vmatpush.msrb.mxu1 %v331_v61  ;;  %405 = vmatpush.msra.mxu2 %v262_v62  ;;  %v318_v7 = vld [vmem:[#allocation8 + $0x200] sm:$0xff]  ;;  %v255_v8 = vld [vmem:[#allocation8 + $0x8] sm:$0xff]  ;;  %v357_v37 = vld [vmem:[#allocation8 + $0x338] sm:$0xff] }
  0x4b   :  { %428 = vmatpush.msra.mxu3 %v326_v63  ;;  %451 = vmatpush.msrb.mxu0 %v263_v0  ;;  %v319_v9 = vld [vmem:[#allocation8 + $0x208] sm:$0xff]  ;;  %v288_v38 = vld [vmem:[#allocation8 + $0x110] sm:$0xff]  ;;  %v289_v40 = vld [vmem:[#allocation8 + $0x118] sm:$0xff] }
  0x4c   :  { %474 = vmatpush.msrb.mxu1 %v327_v1  ;;  %406 = vmatpush.msra.mxu2 %v258_v2  ;;  %v352_v39 = vld [vmem:[#allocation8 + $0x310] sm:$0xff]  ;;  %v353_v41 = vld [vmem:[#allocation8 + $0x318] sm:$0xff] }
  0x4d   :  { %429 = vmatpush.msra.mxu3 %v322_v3  ;;  %452 = vmatpush.msrb.mxu0 %v259_v4  ;;  %v284_v42 = vld [vmem:[#allocation8 + $0xf0] sm:$0xff]  ;;  %v285_v44 = vld [vmem:[#allocation8 + $0xf8] sm:$0xff] }
  0x4e   :  { %475 = vmatpush.msrb.mxu1 %v323_v5  ;;  %407 = vmatpush.msra.mxu2 %v254_v6  ;;  %v348_v43 = vld [vmem:[#allocation8 + $0x2f0] sm:$0xff]  ;;  %v349_v45 = vld [vmem:[#allocation8 + $0x2f8] sm:$0xff] }
  0x4f   :  { %430 = vmatpush.msra.mxu3 %v318_v7  ;;  %453 = vmatpush.msrb.mxu0 %v255_v8  ;;  %v280_v46 = vld [vmem:[#allocation8 + $0xd0] sm:$0xff]  ;;  %v281_v48 = vld [vmem:[#allocation8 + $0xd8] sm:$0xff] }
  0x50   :  { %476 = vmatpush.msrb.mxu1 %v319_v9  ;;  %484 = vmatpush.msrb.mxu2 %v316_v10  ;;  %v344_v47 = vld [vmem:[#allocation8 + $0x2d0] sm:$0xff]  ;;  %v345_v49 = vld [vmem:[#allocation8 + $0x2d8] sm:$0xff] }
  0x51   :  { %507 = vmatpush.msrb.mxu3 %v380_v11  ;;  %530 = vmatpush.msra.mxu0 %v317_v12  ;;  %v276_v50 = vld [vmem:[#allocation8 + $0xb0] sm:$0xff]  ;;  %v277_v52 = vld [vmem:[#allocation8 + $0xb8] sm:$0xff] }
  0x52   :  { %553 = vmatpush.msra.mxu1 %v381_v13  ;;  %485 = vmatpush.msrb.mxu2 %v312_v14  ;;  %v340_v51 = vld [vmem:[#allocation8 + $0x2b0] sm:$0xff]  ;;  %v341_v53 = vld [vmem:[#allocation8 + $0x2b8] sm:$0xff] }
  0x53   :  { %508 = vmatpush.msrb.mxu3 %v376_v15  ;;  %531 = vmatpush.msra.mxu0 %v313_v16  ;;  %v272_v54 = vld [vmem:[#allocation8 + $0x90] sm:$0xff]  ;;  %v273_v56 = vld [vmem:[#allocation8 + $0x98] sm:$0xff] }
  0x54   :  { %554 = vmatpush.msra.mxu1 %v377_v17  ;;  %486 = vmatpush.msrb.mxu2 %v308_v18  ;;  %v336_v55 = vld [vmem:[#allocation8 + $0x290] sm:$0xff]  ;;  %v337_v57 = vld [vmem:[#allocation8 + $0x298] sm:$0xff] }
  0x55   :  { %509 = vmatpush.msrb.mxu3 %v372_v19  ;;  %532 = vmatpush.msra.mxu0 %v309_v20  ;;  %v268_v58 = vld [vmem:[#allocation8 + $0x70] sm:$0xff]  ;;  %v269_v60 = vld [vmem:[#allocation8 + $0x78] sm:$0xff] }
  0x56   :  { %555 = vmatpush.msra.mxu1 %v373_v21  ;;  %487 = vmatpush.msrb.mxu2 %v304_v22  ;;  %v332_v59 = vld [vmem:[#allocation8 + $0x270] sm:$0xff]  ;;  %v333_v61 = vld [vmem:[#allocation8 + $0x278] sm:$0xff] }
  0x57   :  { %510 = vmatpush.msrb.mxu3 %v368_v23  ;;  %533 = vmatpush.msra.mxu0 %v305_v24  ;;  %v264_v62 = vld [vmem:[#allocation8 + $0x50] sm:$0xff]  ;;  %v265_v0 = vld [vmem:[#allocation8 + $0x58] sm:$0xff] }
  0x58   :  { %556 = vmatpush.msra.mxu1 %v369_v25  ;;  %488 = vmatpush.msrb.mxu2 %v300_v26  ;;  %v328_v63 = vld [vmem:[#allocation8 + $0x250] sm:$0xff]  ;;  %v329_v1 = vld [vmem:[#allocation8 + $0x258] sm:$0xff] }
  0x59   :  { %511 = vmatpush.msrb.mxu3 %v364_v27  ;;  %534 = vmatpush.msra.mxu0 %v301_v28  ;;  %v260_v2 = vld [vmem:[#allocation8 + $0x30] sm:$0xff]  ;;  %v261_v4 = vld [vmem:[#allocation8 + $0x38] sm:$0xff] }
  0x5a   :  { %557 = vmatpush.msra.mxu1 %v365_v29  ;;  %489 = vmatpush.msrb.mxu2 %v296_v30  ;;  %v324_v3 = vld [vmem:[#allocation8 + $0x230] sm:$0xff]  ;;  %v325_v5 = vld [vmem:[#allocation8 + $0x238] sm:$0xff] }
  0x5b   :  { %512 = vmatpush.msrb.mxu3 %v360_v31  ;;  %535 = vmatpush.msra.mxu0 %v297_v32  ;;  %v256_v6 = vld [vmem:[#allocation8 + $0x10] sm:$0xff]  ;;  %v257_v8 = vld [vmem:[#allocation8 + $0x18] sm:$0xff] }
  0x5c   :  { %558 = vmatpush.msra.mxu1 %v361_v33  ;;  %490 = vmatpush.msrb.mxu2 %v292_v34  ;;  %v320_v7 = vld [vmem:[#allocation8 + $0x210] sm:$0xff]  ;;  %v321_v9 = vld [vmem:[#allocation8 + $0x218] sm:$0xff] }
  0x5d   :  { %513 = vmatpush.msrb.mxu3 %v356_v35  ;;  %536 = vmatpush.msra.mxu0 %v293_v36  ;;  %v191_v10 = vld [vmem:[#allocation7] sm:$0x3]  ;;  %v614_v22 = vld [vmem:[#allocation11 + $0xf0] sm:$0xff]  ;;  %v613_v28 = vld [vmem:[#allocation11 + $0xe8] sm:$0xff] }
  0x5e   :  { %559 = vmatpush.msra.mxu1 %v357_v37  ;;  %491 = vmatpush.msrb.mxu2 %v288_v38  ;;  %v193_v11 = vperm.slane %v191_v10, 0  ;;  %v194_v12 = vperm.slane %v191_v10, 1  ;;  %v615_v19 = vld [vmem:[#allocation11 + $0xf8] sm:$0xff]  ;;  %v598_v23 = vld [vmem:[#allocation11 + $0x70] sm:$0xff]  ;;  %v597_v29 = vld [vmem:[#allocation11 + $0x68] sm:$0xff] }
  0x5f   :  { %514 = vmatpush.msrb.mxu3 %v352_v39  ;;  %537 = vmatpush.msra.mxu0 %v289_v40  ;;  %v599_v20 = vld [vmem:[#allocation11 + $0x78] sm:$0xff]  ;;  %v646_v25 = vld [vmem:[#allocation11 + $0x1f0] sm:$0xff]  ;;  %v645_v32 = vld [vmem:[#allocation11 + $0x1e8] sm:$0xff] }
  0x60   :  { %560 = vmatpush.msra.mxu1 %v353_v41  ;;  %492 = vmatpush.msrb.mxu2 %v284_v42  ;;  %v647_v21 = vld [vmem:[#allocation11 + $0x1f8] sm:$0xff]  ;;  %v612_v35 = vld [vmem:[#allocation11 + $0xe0] sm:$0xff]  ;;  %v610_v40 = vld [vmem:[#allocation11 + $0xd0] sm:$0xff] }
  0x61   :  { %515 = vmatpush.msrb.mxu3 %v348_v43  ;;  %538 = vmatpush.msra.mxu0 %v285_v44  ;;  %v631_v24 = vld [vmem:[#allocation11 + $0x178] sm:$0xff]  ;;  %v596_v36 = vld [vmem:[#allocation11 + $0x60] sm:$0xff]  ;;  %v594_v41 = vld [vmem:[#allocation11 + $0x50] sm:$0xff] }
  0x62   :  { %561 = vmatpush.msra.mxu1 %v349_v45  ;;  %493 = vmatpush.msrb.mxu2 %v280_v46  ;;  %v644_v37 = vld [vmem:[#allocation11 + $0x1e0] sm:$0xff]  ;;  %v611_v38 = vld [vmem:[#allocation11 + $0xd8] sm:$0xff]  ;;  %v609_v42 = vld [vmem:[#allocation11 + $0xc8] sm:$0xff] }
  0x63   :  { %516 = vmatpush.msrb.mxu3 %v344_v47  ;;  %539 = vmatpush.msra.mxu0 %v281_v48  ;;  %v595_v39 = vld [vmem:[#allocation11 + $0x58] sm:$0xff]  ;;  %v593_v43 = vld [vmem:[#allocation11 + $0x48] sm:$0xff]  ;;  %v608_v44 = vld [vmem:[#allocation11 + $0xc0] sm:$0xff] }
  0x64   :  { %562 = vmatpush.msra.mxu1 %v345_v49  ;;  %494 = vmatpush.msrb.mxu2 %v276_v50  ;;  %v592_v45 = vld [vmem:[#allocation11 + $0x40] sm:$0xff]  ;;  %v607_v46 = vld [vmem:[#allocation11 + $0xb8] sm:$0xff]  ;;  %v606_v48 = vld [vmem:[#allocation11 + $0xb0] sm:$0xff] }
  0x65   :  { %517 = vmatpush.msrb.mxu3 %v340_v51  ;;  %540 = vmatpush.msra.mxu0 %v277_v52  ;;  %v591_v47 = vld [vmem:[#allocation11 + $0x38] sm:$0xff]  ;;  %v605_v49 = vld [vmem:[#allocation11 + $0xa8] sm:$0xff]  ;;  %v604_v50 = vld [vmem:[#allocation11 + $0xa0] sm:$0xff] }
  0x66   :  { %563 = vmatpush.msra.mxu1 %v341_v53  ;;  %495 = vmatpush.msrb.mxu2 %v272_v54  ;;  %v590_v51 = vld [vmem:[#allocation11 + $0x30] sm:$0xff]  ;;  %v603_v52 = vld [vmem:[#allocation11 + $0x98] sm:$0xff]  ;;  %v624_v10 = vld [vmem:[#allocation11 + $0x140] sm:$0xff] }
  0x67   :  { %518 = vmatpush.msrb.mxu3 %v336_v55  ;;  %541 = vmatpush.msra.mxu0 %v273_v56  ;;  %v630_v53 = vld [vmem:[#allocation11 + $0x170] sm:$0xff]  ;;  %v643_v54 = vld [vmem:[#allocation11 + $0x1d8] sm:$0xff]  ;;  %v589_v55 = vld [vmem:[#allocation11 + $0x28] sm:$0xff] }
  0x68   :  { %564 = vmatpush.msra.mxu1 %v337_v57  ;;  %496 = vmatpush.msrb.mxu2 %v268_v58  ;;  %v602_v56 = vld [vmem:[#allocation11 + $0x90] sm:$0xff]  ;;  %v629_v57 = vld [vmem:[#allocation11 + $0x168] sm:$0xff] }
  0x69   :  { %519 = vmatpush.msrb.mxu3 %v332_v59  ;;  %542 = vmatpush.msra.mxu0 %v269_v60  ;;  %v642_v58 = vld [vmem:[#allocation11 + $0x1d0] sm:$0xff]  ;;  %v588_v59 = vld [vmem:[#allocation11 + $0x20] sm:$0xff]  ;;  %v601_v60 = vld [vmem:[#allocation11 + $0x88] sm:$0xff] }
  0x6a   :  { %565 = vmatpush.msra.mxu1 %v333_v61  ;;  %497 = vmatpush.msrb.mxu2 %v264_v62  ;;  %v628_v61 = vld [vmem:[#allocation11 + $0x160] sm:$0xff]  ;;  %v641_v62 = vld [vmem:[#allocation11 + $0x1c8] sm:$0xff] }
  0x6b   :  { %520 = vmatpush.msrb.mxu3 %v328_v63  ;;  %543 = vmatpush.msra.mxu0 %v265_v0  ;;  %v587_v63 = vld [vmem:[#allocation11 + $0x18] sm:$0xff]  ;;  %v600_v0 = vld [vmem:[#allocation11 + $0x80] sm:$0xff] }
  0x6c   :  { %566 = vmatpush.msra.mxu1 %v329_v1  ;;  %498 = vmatpush.msrb.mxu2 %v260_v2  ;;  %v627_v1 = vld [vmem:[#allocation11 + $0x158] sm:$0xff]  ;;  %v640_v2 = vld [vmem:[#allocation11 + $0x1c0] sm:$0xff] }
  0x6d   :  { %521 = vmatpush.msrb.mxu3 %v324_v3  ;;  %544 = vmatpush.msra.mxu0 %v261_v4  ;;  %v586_v3 = vld [vmem:[#allocation11 + $0x10] sm:$0xff] }
  0x6e   :  { %567 = vmatpush.msra.mxu1 %v325_v5  ;;  %499 = vmatpush.msrb.mxu2 %v256_v6  ;;  %v626_v4 = vld [vmem:[#allocation11 + $0x150] sm:$0xff]  ;;  %v639_v5 = vld [vmem:[#allocation11 + $0x1b8] sm:$0xff]  ;;  %v585_v6 = vld [vmem:[#allocation11 + $0x8] sm:$0xff] }
  0x6f   :  { %522 = vmatpush.msrb.mxu3 %v320_v7  ;;  %545 = vmatpush.msra.mxu0 %v257_v8  ;;  %v625_v7 = vld [vmem:[#allocation11 + $0x148] sm:$0xff]  ;;  %v638_v8 = vld [vmem:[#allocation11 + $0x1b0] sm:$0xff] }
  0x70   :  { %568 = vmatpush.msra.mxu1 %v321_v9  ;;  %v584_v9 = vld [vmem:[#allocation11] sm:$0xff] }
  0xad   :  { %v221_v13 = vpop.f32.mrf.mxu0 }
  0xae   :  { %v244_v14 = vpop.f32.mrf.mxu1  ;;  %v222_v15 = vadd.f32 %v221_v13, %v193_v11  ;;  %v636_v13 = vld [vmem:[#allocation11 + $0x1a0] sm:$0xff] }
  0xaf   :  { %v245_v16 = vadd.f32 %v244_v14, %v194_v12  ;;  %v622_v14 = vld [vmem:[#allocation11 + $0x130] sm:$0xff] }
  0xb0   :  { %v250_v17 = vmax.f32 %v222_v15, 0.0  ;;  %v635_v15 = vld [vmem:[#allocation11 + $0x198] sm:$0xff] }
  0xb1   :  { %v251_v18 = vmax.f32 %v245_v16, 0.0  ;;  %v621_v16 = vld [vmem:[#allocation11 + $0x128] sm:$0xff] }
  0xb2   :  { %408 = vmatmul.f32.vlgmr.msra.gmra.mxu2 %v250_v17  ;;  %454 = vmatmul.f32.vlgmr.msrb.gmra.mxu0 %v250_v17 }
  0xb3   :  { %431 = vmatmul.f32.vlgmr.msra.gmra.mxu3 %v251_v18  ;;  %477 = vmatmul.f32.vlgmr.msrb.gmra.mxu1 %v251_v18 }
  0xb4   :  { %675 = vmatpush.msra.mxu3 %v615_v19  ;;  %652 = vmatpush.msra.mxu2 %v599_v20  ;;  %v633_v19 = vld [vmem:[#allocation11 + $0x188] sm:$0xff]  ;;  %v619_v20 = vld [vmem:[#allocation11 + $0x118] sm:$0xff] }
  0xb5   :  { %v224_v26 = vpop.f32.mrf.mxu0  ;;  %721 = vmatpush.msrb.mxu1 %v647_v21  ;;  %698 = vmatpush.msrb.mxu0 %v631_v24  ;;  %v632_v21 = vld [vmem:[#allocation11 + $0x180] sm:$0xff]  ;;  %v1755_v24 = vld [vmem:[#allocation10] sm:$0xf] }
  0xb6   :  { %v247_v27 = vpop.f32.mrf.mxu1  ;;  %v225_v30 = vadd.f32 %v224_v26, %v193_v11  ;;  %676 = vmatpush.msra.mxu3 %v614_v22  ;;  %653 = vmatpush.msra.mxu2 %v598_v23  ;;  %v637_v11 = vld [vmem:[#allocation11 + $0x1a8] sm:$0xff]  ;;  %v618_v22 = vld [vmem:[#allocation11 + $0x110] sm:$0xff]  ;;  %v385_v26 = vperm.slane %v1755_v24, 1 }
  0xb7   :  { %v248_v31 = vadd.f32 %v247_v27, %v194_v12  ;;  %722 = vmatpush.msrb.mxu1 %v646_v25  ;;  %699 = vmatpush.msrb.mxu0 %v630_v53  ;;  %v623_v12 = vld [vmem:[#allocation11 + $0x138] sm:$0xff]  ;;  %v617_v23 = vld [vmem:[#allocation11 + $0x108] sm:$0xff]  ;;  %v616_v25 = vld [vmem:[#allocation11 + $0x100] sm:$0xff] }
  0xb8   :  { %v252_v33 = vmax.f32 %v225_v30, 0.0  ;;  %677 = vmatpush.msra.mxu3 %v613_v28  ;;  %654 = vmatpush.msra.mxu2 %v597_v29  ;;  %v384_v30 = vperm.slane %v1755_v24, 0  ;;  %v793_v53 = vld [vmem:[#allocation13 + $0x188] sm:$0xff] }
  0xb9   :  { %v253_v34 = vmax.f32 %v248_v31, 0.0  ;;  %723 = vmatpush.msrb.mxu1 %v645_v32  ;;  %700 = vmatpush.msrb.mxu0 %v629_v57  ;;  %v804_v32 = vld [vmem:[#allocation13 + $0x1e0] sm:$0xff] }
  0xba   :  { %411 = vmatmul.f32.gmra.mxu2 %v252_v33  ;;  %457 = vmatmul.f32.gmra.mxu0 %v252_v33 }
  0xbb   :  { %434 = vmatmul.f32.gmra.mxu3 %v253_v34  ;;  %480 = vmatmul.f32.gmra.mxu1 %v253_v34 }
  0xbc   :  { %678 = vmatpush.msra.mxu3 %v612_v35  ;;  %655 = vmatpush.msra.mxu2 %v596_v36 }
  0xbd   :  { %724 = vmatpush.msrb.mxu1 %v644_v37  ;;  %701 = vmatpush.msrb.mxu0 %v628_v61 }
  0xbe   :  { %679 = vmatpush.msra.mxu3 %v611_v38  ;;  %656 = vmatpush.msra.mxu2 %v595_v39  ;;  %v807_v38 = vld [vmem:[#allocation13 + $0x1f8] sm:$0xff]  ;;  %v800_v39 = vld [vmem:[#allocation13 + $0x1c0] sm:$0xff] }
  0xbf   :  { %725 = vmatpush.msrb.mxu1 %v643_v54  ;;  %702 = vmatpush.msrb.mxu0 %v627_v1  ;;  %v791_v1 = vld [vmem:[#allocation13 + $0x178] sm:$0xff] }
  0xc0   :  { %680 = vmatpush.msra.mxu3 %v610_v40  ;;  %657 = vmatpush.msra.mxu2 %v594_v41  ;;  %v801_v40 = vld [vmem:[#allocation13 + $0x1c8] sm:$0xff] }
  0xc1   :  { %726 = vmatpush.msrb.mxu1 %v642_v58  ;;  %703 = vmatpush.msrb.mxu0 %v626_v4  ;;  %v788_v58 = vld [vmem:[#allocation13 + $0x160] sm:$0xff] }
  0xc2   :  { %500 = vmatmul.f32.vlgmr.msrb.gmra.mxu2 %v250_v17  ;;  %546 = vmatmul.f32.vlgmr.msra.gmra.mxu0 %v250_v17  ;;  %v634_v17 = vld [vmem:[#allocation11 + $0x190] sm:$0xff] }
  0xc3   :  { %523 = vmatmul.f32.vlgmr.msrb.gmra.mxu3 %v251_v18  ;;  %569 = vmatmul.f32.vlgmr.msra.gmra.mxu1 %v251_v18  ;;  %v620_v18 = vld [vmem:[#allocation11 + $0x120] sm:$0xff] }
  0xc4   :  { %681 = vmatpush.msra.mxu3 %v609_v42  ;;  %658 = vmatpush.msra.mxu2 %v593_v43  ;;  %v802_v42 = vld [vmem:[#allocation13 + $0x1d0] sm:$0xff]  ;;  %v803_v43 = vld [vmem:[#allocation13 + $0x1d8] sm:$0xff] }
  0xc5   :  { %727 = vmatpush.msrb.mxu1 %v641_v62  ;;  %704 = vmatpush.msrb.mxu0 %v625_v7 }
  0xc6   :  { %682 = vmatpush.msra.mxu3 %v608_v44  ;;  %659 = vmatpush.msra.mxu2 %v592_v45  ;;  %v796_v44 = vld [vmem:[#allocation13 + $0x1a0] sm:$0xff]  ;;  %v797_v45 = vld [vmem:[#allocation13 + $0x1a8] sm:$0xff] }
  0xc7   :  { %728 = vmatpush.msrb.mxu1 %v640_v2  ;;  %705 = vmatpush.msrb.mxu0 %v624_v10 }
  0xc8   :  { %683 = vmatpush.msra.mxu3 %v607_v46  ;;  %660 = vmatpush.msra.mxu2 %v591_v47  ;;  %v798_v46 = vld [vmem:[#allocation13 + $0x1b0] sm:$0xff] }
  0xc9   :  { %729 = vmatpush.msrb.mxu1 %v639_v5  ;;  %706 = vmatpush.msrb.mxu0 %v623_v12 }
  0xca   :  { %503 = vmatmul.f32.gmra.mxu2 %v252_v33  ;;  %549 = vmatmul.f32.gmra.mxu0 %v252_v33  ;;  %v805_v33 = vld [vmem:[#allocation13 + $0x1e8] sm:$0xff] }
  0xcb   :  { %526 = vmatmul.f32.gmra.mxu3 %v253_v34  ;;  %572 = vmatmul.f32.gmra.mxu1 %v253_v34  ;;  %v806_v34 = vld [vmem:[#allocation13 + $0x1f0] sm:$0xff] }
  0xcc   :  { %684 = vmatpush.msra.mxu3 %v606_v48  ;;  %661 = vmatpush.msra.mxu2 %v590_v51  ;;  %v792_v51 = vld [vmem:[#allocation13 + $0x180] sm:$0xff] }
  0xcd   :  { %730 = vmatpush.msrb.mxu1 %v638_v8  ;;  %707 = vmatpush.msrb.mxu0 %v622_v14  ;;  %v386_v8 = vperm.slane %v1755_v24, 2 }
  0xce   :  { %685 = vmatpush.msra.mxu3 %v605_v49  ;;  %662 = vmatpush.msra.mxu2 %v589_v55  ;;  %v794_v55 = vld [vmem:[#allocation13 + $0x190] sm:$0xff] }
  0xcf   :  { %731 = vmatpush.msrb.mxu1 %v637_v11  ;;  %708 = vmatpush.msrb.mxu0 %v621_v16 }
  0xd0   :  { %686 = vmatpush.msra.mxu3 %v604_v50  ;;  %663 = vmatpush.msra.mxu2 %v588_v59  ;;  %v799_v50 = vld [vmem:[#allocation13 + $0x1b8] sm:$0xff]  ;;  %v789_v59 = vld [vmem:[#allocation13 + $0x168] sm:$0xff] }
  0xd1   :  { %732 = vmatpush.msrb.mxu1 %v636_v13  ;;  %709 = vmatpush.msrb.mxu0 %v620_v18 }
  0xd2   :  { %687 = vmatpush.msra.mxu3 %v603_v52  ;;  %664 = vmatpush.msra.mxu2 %v587_v63 }
  0xd3   :  { %733 = vmatpush.msrb.mxu1 %v635_v15  ;;  %710 = vmatpush.msrb.mxu0 %v619_v20 }
  0xd4   :  { %688 = vmatpush.msra.mxu3 %v602_v56  ;;  %665 = vmatpush.msra.mxu2 %v586_v3  ;;  %v795_v56 = vld [vmem:[#allocation13 + $0x198] sm:$0xff] }
  0xd5   :  { %734 = vmatpush.msrb.mxu1 %v634_v17  ;;  %711 = vmatpush.msrb.mxu0 %v618_v22 }
  0xd6   :  { %689 = vmatpush.msra.mxu3 %v601_v60  ;;  %666 = vmatpush.msra.mxu2 %v585_v6  ;;  %v790_v60 = vld [vmem:[#allocation13 + $0x170] sm:$0xff] }
  0xd7   :  { %735 = vmatpush.msrb.mxu1 %v633_v19  ;;  %712 = vmatpush.msrb.mxu0 %v617_v23 }
  0xd8   :  { %690 = vmatpush.msra.mxu3 %v600_v0  ;;  %667 = vmatpush.msra.mxu2 %v584_v9  ;;  %v387_v0 = vperm.slane %v1755_v24, 3 }
  0xd9   :  { %736 = vmatpush.msrb.mxu1 %v632_v21  ;;  %713 = vmatpush.msrb.mxu0 %v616_v25 }
  0xda   :  { %818 = vmatpush.msrb.mxu2 %v804_v32  ;;  %841 = vmatpush.msrb.mxu3 %v805_v33  ;;  %v782_v32 = vld [vmem:[#allocation13 + $0x130] sm:$0xff]  ;;  %v783_v33 = vld [vmem:[#allocation13 + $0x138] sm:$0xff] }
  0xdb   :  { %864 = vmatpush.msra.mxu0 %v806_v34  ;;  %887 = vmatpush.msra.mxu1 %v807_v38  ;;  %v776_v34 = vld [vmem:[#allocation13 + $0x100] sm:$0xff] }
  0xdc   :  { %819 = vmatpush.msrb.mxu2 %v800_v39  ;;  %842 = vmatpush.msrb.mxu3 %v801_v40  ;;  %v772_v38 = vld [vmem:[#allocation13 + $0xe0] sm:$0xff]  ;;  %v773_v39 = vld [vmem:[#allocation13 + $0xe8] sm:$0xff]  ;;  %v774_v40 = vld [vmem:[#allocation13 + $0xf0] sm:$0xff] }
  0xdd   :  { %865 = vmatpush.msra.mxu0 %v802_v42  ;;  %888 = vmatpush.msra.mxu1 %v803_v43  ;;  %v768_v42 = vld [vmem:[#allocation13 + $0xc0] sm:$0xff]  ;;  %v769_v43 = vld [vmem:[#allocation13 + $0xc8] sm:$0xff] }
  0xde   :  { %820 = vmatpush.msrb.mxu2 %v796_v44  ;;  %843 = vmatpush.msrb.mxu3 %v797_v45  ;;  %v770_v44 = vld [vmem:[#allocation13 + $0xd0] sm:$0xff]  ;;  %v771_v45 = vld [vmem:[#allocation13 + $0xd8] sm:$0xff] }
  0xdf   :  { %866 = vmatpush.msra.mxu0 %v798_v46  ;;  %889 = vmatpush.msra.mxu1 %v799_v50  ;;  %v764_v46 = vld [vmem:[#allocation13 + $0xa0] sm:$0xff] }
  0xe0   :  { %821 = vmatpush.msrb.mxu2 %v792_v51  ;;  %844 = vmatpush.msrb.mxu3 %v793_v53  ;;  %v760_v50 = vld [vmem:[#allocation13 + $0x80] sm:$0xff]  ;;  %v761_v51 = vld [vmem:[#allocation13 + $0x88] sm:$0xff]  ;;  %v763_v53 = vld [vmem:[#allocation13 + $0x98] sm:$0xff] }
  0xe1   :  { %867 = vmatpush.msra.mxu0 %v794_v55  ;;  %890 = vmatpush.msra.mxu1 %v795_v56  ;;  %v757_v55 = vld [vmem:[#allocation13 + $0x68] sm:$0xff]  ;;  %v758_v56 = vld [vmem:[#allocation13 + $0x70] sm:$0xff] }
  0xe2   :  { %822 = vmatpush.msrb.mxu2 %v788_v58  ;;  %845 = vmatpush.msrb.mxu3 %v789_v59  ;;  %v752_v58 = vld [vmem:[#allocation13 + $0x40] sm:$0xff]  ;;  %v753_v59 = vld [vmem:[#allocation13 + $0x48] sm:$0xff] }
  0xe3   :  { %868 = vmatpush.msra.mxu0 %v790_v60  ;;  %891 = vmatpush.msra.mxu1 %v791_v1  ;;  %v754_v60 = vld [vmem:[#allocation13 + $0x50] sm:$0xff]  ;;  %v751_v1 = vld [vmem:[#allocation13 + $0x38] sm:$0xff] }
 0x12f   :  { %v455_v27 = vpop.f32.mrf.mxu0 }
 0x130   :  { %v478_v28 = vpop.f32.mrf.mxu1  ;;  %v456_v29 = vadd.f32 %v455_v27, %v385_v26  ;;  %v785_v27 = vld [vmem:[#allocation13 + $0x148] sm:$0xff] }
 0x131   :  { %846 = vmatpush.msrb.mxu3 %v785_v27  ;;  %v1369_v27 = vld [vmem:[%s1785_s6] ss:$0 sm:$0xff] }
 0x132   :  { %v479_v31 = vadd.f32 %v478_v28, %v456_v29  ;;  %v786_v28 = vld [vmem:[#allocation13 + $0x150] sm:$0xff]  ;;  %v787_v29 = vld [vmem:[#allocation13 + $0x158] sm:$0xff] }
 0x133   :  { %869 = vmatpush.msra.mxu0 %v786_v28  ;;  %892 = vmatpush.msra.mxu1 %v787_v29  ;;  %v940_v28 = vld [vmem:[#allocation14 + $0xb0] sm:$0xff] }
 0x134   :  { %v577_v35 = vmax.f32 %v479_v31, 0.0  ;;  %v781_v31 = vld [vmem:[#allocation13 + $0x128] sm:$0xff]  ;;  %v972_v29 = vld [vmem:[#allocation14 + $0x1b0] sm:$0xff] }
 0x135   :  { %v409_v36 = vpop.f32.mrf.mxu2  ;;  %847 = vmatpush.msrb.mxu3 %v781_v31  ;;  %870 = vmatpush.msra.mxu0 %v782_v32  ;;  %v1032_v31 = vld [vmem:[#allocation14 + $0x390] sm:$0xff]  ;;  %v938_v32 = vld [vmem:[#allocation14 + $0xa0] sm:$0xff] }
 0x136   :  { %v432_v37 = vpop.f32.mrf.mxu3  ;;  %v410_v41 = vadd.f32 %v409_v36, %v384_v30  ;;  %691 = vmatmul.f32.vlgmr.msra.gmra.mxu3 %v577_v35  ;;  %v777_v35 = vld [vmem:[#allocation13 + $0x108] sm:$0xff]  ;;  %v778_v36 = vld [vmem:[#allocation13 + $0x110] sm:$0xff]  ;;  %893 = vmatpush.msra.mxu1 %v783_v33  ;;  %v970_v33 = vld [vmem:[#allocation14 + $0x1a0] sm:$0xff] }
 0x137   :  { %v458_v48 = vpop.f32.mrf.mxu0  ;;  %848 = vmatpush.msrb.mxu3 %v777_v35  ;;  %871 = vmatpush.msra.mxu0 %v778_v36  ;;  %v1030_v35 = vld [vmem:[#allocation14 + $0x380] sm:$0xff] }
 0x138   :  { %v433_v47 = vadd.f32 %v432_v37, %v410_v41  ;;  %v481_v49 = vpop.f32.mrf.mxu1  ;;  %v459_v52 = vadd.f32 %v458_v48, %v385_v26  ;;  %v784_v26 = vld [vmem:[#allocation13 + $0x140] sm:$0xff]  ;;  %v779_v37 = vld [vmem:[#allocation13 + $0x118] sm:$0xff]  ;;  %v766_v48 = vld [vmem:[#allocation13 + $0xb0] sm:$0xff] }
 0x139   :  { %823 = vmatpush.msrb.mxu2 %v784_v26  ;;  %894 = vmatpush.msra.mxu1 %v779_v37  ;;  %v775_v41 = vld [vmem:[#allocation13 + $0xf8] sm:$0xff]  ;;  %v1034_v26 = vld [vmem:[#allocation14 + $0x3a0] sm:$0xff]  ;;  %v936_v37 = vld [vmem:[#allocation14 + $0x90] sm:$0xff] }
 0x13a   :  { %v576_v54 = vmax.f32 %v433_v47, 0.0  ;;  %v482_v57 = vadd.f32 %v481_v49, %v459_v52  ;;  %849 = vmatpush.msrb.mxu3 %v773_v39  ;;  %872 = vmatpush.msra.mxu0 %v774_v40  ;;  %v765_v47 = vld [vmem:[#allocation13 + $0xa8] sm:$0xff]  ;;  %v767_v49 = vld [vmem:[#allocation13 + $0xb8] sm:$0xff]  ;;  %v762_v52 = vld [vmem:[#allocation13 + $0x90] sm:$0xff] }
 0x13b   :  { %895 = vmatpush.msra.mxu1 %v775_v41  ;;  %v996_v40 = vld [vmem:[#allocation14 + $0x270] sm:$0xff] }
 0x13c   :  { %668 = vmatmul.f32.vlgmr.msra.gmra.mxu2 %v576_v54  ;;  %v581_v61 = vmax.f32 %v482_v57, 0.0  ;;  %850 = vmatpush.msrb.mxu3 %v769_v43  ;;  %v756_v54 = vld [vmem:[#allocation13 + $0x60] sm:$0xff]  ;;  %v759_v57 = vld [vmem:[#allocation13 + $0x78] sm:$0xff]  ;;  %v1028_v41 = vld [vmem:[#allocation14 + $0x370] sm:$0xff] }
 0x13d   :  { %v412_v62 = vpop.f32.mrf.mxu2  ;;  %873 = vmatpush.msra.mxu0 %v770_v44  ;;  %896 = vmatpush.msra.mxu1 %v771_v45  ;;  %v966_v43 = vld [vmem:[#allocation14 + $0x180] sm:$0xff] }
 0x13e   :  { %v435_v63 = vpop.f32.mrf.mxu3  ;;  %v413_v2 = vadd.f32 %v412_v62, %v384_v30  ;;  %694 = vmatmul.f32.gmra.mxu3 %v581_v61  ;;  %v780_v30 = vld [vmem:[#allocation13 + $0x120] sm:$0xff]  ;;  %v755_v61 = vld [vmem:[#allocation13 + $0x58] sm:$0xff] }
 0x13f   :  { %v547_v4 = vpop.f32.mrf.mxu0  ;;  %824 = vmatpush.msrb.mxu2 %v780_v30  ;;  %851 = vmatpush.msrb.mxu3 %v765_v47  ;;  %v748_v62 = vld [vmem:[#allocation13 + $0x20] sm:$0xff]  ;;  %v1000_v30 = vld [vmem:[#allocation14 + $0x290] sm:$0xff] }
 0x140   :  { %v436_v3 = vadd.f32 %v435_v63, %v413_v2  ;;  %v570_v5 = vpop.f32.mrf.mxu1  ;;  %v548_v6 = vadd.f32 %v547_v4, %v387_v0  ;;  %874 = vmatpush.msra.mxu0 %v766_v48  ;;  %897 = vmatpush.msra.mxu1 %v767_v49  ;;  %v749_v63 = vld [vmem:[#allocation13 + $0x28] sm:$0xff]  ;;  %v744_v2 = vld [vmem:[#allocation13] sm:$0xff]  ;;  %v746_v4 = vld [vmem:[#allocation13 + $0x10] sm:$0xff] }
 0x141   :  { %825 = vmatpush.msrb.mxu2 %v776_v34  ;;  %852 = vmatpush.msrb.mxu3 %v761_v51  ;;  %v998_v34 = vld [vmem:[#allocation14 + $0x280] sm:$0xff]  ;;  %v932_v48 = vld [vmem:[#allocation14 + $0x70] sm:$0xff] }
 0x142   :  { %v580_v7 = vmax.f32 %v436_v3, 0.0  ;;  %v571_v9 = vadd.f32 %v570_v5, %v548_v6  ;;  %875 = vmatpush.msra.mxu0 %v762_v52  ;;  %898 = vmatpush.msra.mxu1 %v763_v53  ;;  %v745_v3 = vld [vmem:[#allocation13 + $0x8] sm:$0xff]  ;;  %v747_v5 = vld [vmem:[#allocation13 + $0x18] sm:$0xff]  ;;  %v1012_v6 = vld [vmem:[#allocation14 + $0x2f0] sm:$0xff] }
 0x143   :  { %826 = vmatpush.msrb.mxu2 %v772_v38  ;;  %853 = vmatpush.msrb.mxu3 %v757_v55  ;;  %v968_v38 = vld [vmem:[#allocation14 + $0x190] sm:$0xff]  ;;  %v994_v44 = vld [vmem:[#allocation14 + $0x260] sm:$0xff] }
 0x144   :  { %671 = vmatmul.f32.gmra.mxu2 %v580_v7  ;;  %v579_v10 = vmax.f32 %v571_v9, 0.0  ;;  %876 = vmatpush.msra.mxu0 %v758_v56  ;;  %v1044_v7 = vld [vmem:[#allocation14 + $0x3f0] sm:$0xff]  ;;  %v1042_v9 = vld [vmem:[#allocation14 + $0x3e0] sm:$0xff] }
 0x145   :  { %v501_v11 = vpop.f32.mrf.mxu2  ;;  %827 = vmatpush.msrb.mxu2 %v768_v42  ;;  %899 = vmatpush.msra.mxu1 %v759_v57  ;;  %v934_v42 = vld [vmem:[#allocation14 + $0x80] sm:$0xff]  ;;  %v964_v49 = vld [vmem:[#allocation14 + $0x170] sm:$0xff] }
 0x146   :  { %v524_v12 = vpop.f32.mrf.mxu3  ;;  %v502_v13 = vadd.f32 %v501_v11, %v386_v8  ;;  %737 = vmatmul.f32.vlgmr.msrb.gmra.mxu1 %v579_v10  ;;  %854 = vmatpush.msrb.mxu3 %v753_v59  ;;  %v1008_v10 = vld [vmem:[#allocation14 + $0x2d0] sm:$0xff]  ;;  %v1026_v45 = vld [vmem:[#allocation14 + $0x360] sm:$0xff] }
 0x147   :  { %v550_v15 = vpop.f32.mrf.mxu0  ;;  %828 = vmatpush.msrb.mxu2 %v764_v46  ;;  %877 = vmatpush.msra.mxu0 %v754_v60  ;;  %v1040_v11 = vld [vmem:[#allocation14 + $0x3d0] sm:$0xff]  ;;  %v930_v55 = vld [vmem:[#allocation14 + $0x60] sm:$0xff] }
 0x148   :  { %v525_v14 = vadd.f32 %v524_v12, %v502_v13  ;;  %v551_v16 = vadd.f32 %v550_v15, %v387_v0  ;;  %v573_v18 = vpop.f32.mrf.mxu1  ;;  %900 = vmatpush.msra.mxu1 %v755_v61  ;;  %v750_v0 = vld [vmem:[#allocation13 + $0x30] sm:$0xff]  ;;  %855 = vmatpush.msrb.mxu3 %v749_v63  ;;  %v978_v15 = vld [vmem:[#allocation14 + $0x1e0] sm:$0xff] }
 0x149   :  { %829 = vmatpush.msrb.mxu2 %v760_v50  ;;  %878 = vmatpush.msra.mxu0 %v750_v0  ;;  %v948_v12 = vld [vmem:[#allocation14 + $0xf0] sm:$0xff]  ;;  %v962_v56 = vld [vmem:[#allocation14 + $0x160] sm:$0xff] }
 0x14a   :  { %v578_v17 = vmax.f32 %v525_v14, 0.0  ;;  %v574_v19 = vadd.f32 %v573_v18, %v551_v16  ;;  %901 = vmatpush.msra.mxu1 %v751_v1  ;;  %856 = vmatpush.msrb.mxu3 %v745_v3  ;;  %v980_v13 = vld [vmem:[#allocation14 + $0x1f0] sm:$0xff]  ;;  %v946_v14 = vld [vmem:[#allocation14 + $0xe0] sm:$0xff] }
 0x14b   :  { %830 = vmatpush.msrb.mxu2 %v756_v54  ;;  %879 = vmatpush.msra.mxu0 %v746_v4  ;;  %v1006_v16 = vld [vmem:[#allocation14 + $0x2c0] sm:$0xff]  ;;  %v944_v18 = vld [vmem:[#allocation14 + $0xd0] sm:$0xff] }
 0x14c   :  { %714 = vmatmul.f32.vlgmr.msrb.gmra.mxu0 %v578_v17  ;;  %v583_v20 = vmax.f32 %v574_v19, 0.0  ;;  %902 = vmatpush.msra.mxu1 %v747_v5  ;;  %v1038_v17 = vld [vmem:[#allocation14 + $0x3c0] sm:$0xff]  ;;  %v976_v19 = vld [vmem:[#allocation14 + $0x1d0] sm:$0xff] }
 0x14d   :  { %v504_v21 = vpop.f32.mrf.mxu2  ;;  %831 = vmatpush.msrb.mxu2 %v752_v58  ;;  %1098 = vmatpush.msrb.mxu0 %v1012_v6  ;;  %v992_v52 = vld [vmem:[#allocation14 + $0x250] sm:$0xff]  ;;  %v990_v59 = vld [vmem:[#allocation14 + $0x240] sm:$0xff] }
 0x14e   :  { %v505_v22 = vadd.f32 %v504_v21, %v386_v8  ;;  %v527_v23 = vpop.f32.mrf.mxu3  ;;  %740 = vmatmul.f32.gmra.mxu1 %v583_v20  ;;  %v1010_v8 = vld [vmem:[#allocation14 + $0x2e0] sm:$0xff]  ;;  %1075 = vmatpush.msra.mxu3 %v980_v13  ;;  %v1004_v20 = vld [vmem:[#allocation14 + $0x2b0] sm:$0xff] }
 0x14f   :  { %832 = vmatpush.msrb.mxu2 %v748_v62  ;;  %1121 = vmatpush.msrb.mxu1 %v1044_v7  ;;  %v1036_v21 = vld [vmem:[#allocation14 + $0x3b0] sm:$0xff]  ;;  %v1022_v60 = vld [vmem:[#allocation14 + $0x340] sm:$0xff] }
 0x150   :  { %v528_v24 = vadd.f32 %v527_v23, %v505_v22  ;;  %1099 = vmatpush.msrb.mxu0 %v1010_v8  ;;  %1076 = vmatpush.msra.mxu3 %v978_v15  ;;  %v942_v22 = vld [vmem:[#allocation14 + $0xc0] sm:$0xff]  ;;  %v1024_v53 = vld [vmem:[#allocation14 + $0x350] sm:$0xff] }
 0x151   :  { %833 = vmatpush.msrb.mxu2 %v744_v2  ;;  %1122 = vmatpush.msrb.mxu1 %v1042_v9  ;;  %v974_v23 = vld [vmem:[#allocation14 + $0x1c0] sm:$0xff]  ;;  %v928_v61 = vld [vmem:[#allocation14 + $0x50] sm:$0xff] }
 0x152   :  { %v582_v25 = vmax.f32 %v528_v24, 0.0  ;;  %1100 = vmatpush.msrb.mxu0 %v1008_v10  ;;  %1077 = vmatpush.msra.mxu3 %v976_v19  ;;  %v960_v62 = vld [vmem:[#allocation14 + $0x150] sm:$0xff]  ;;  %v926_v3 = vld [vmem:[#allocation14 + $0x40] sm:$0xff]  ;;  %v1013_v19 = vld [vmem:[#allocation14 + $0x2f8] sm:$0xff] }
 0x153   :  { %1052 = vmatpush.msra.mxu2 %v948_v12  ;;  %1123 = vmatpush.msrb.mxu1 %v1040_v11  ;;  %v988_v0 = vld [vmem:[#allocation14 + $0x230] sm:$0xff]  ;;  %v958_v4 = vld [vmem:[#allocation14 + $0x140] sm:$0xff] }
 0x154   :  { %717 = vmatmul.f32.gmra.mxu0 %v582_v25  ;;  %v1002_v25 = vld [vmem:[#allocation14 + $0x2a0] sm:$0xff]  ;;  %1078 = vmatpush.msra.mxu3 %v974_v23  ;;  %v1020_v1 = vld [vmem:[#allocation14 + $0x330] sm:$0xff]  ;;  %v1011_v23 = vld [vmem:[#allocation14 + $0x2e8] sm:$0xff] }
 0x155   :  { %1053 = vmatpush.msra.mxu2 %v946_v14  ;;  %1101 = vmatpush.msrb.mxu0 %v1006_v16  ;;  %v986_v6 = vld [vmem:[#allocation14 + $0x220] sm:$0xff]  ;;  %v924_v9 = vld [vmem:[#allocation14 + $0x30] sm:$0xff] }
 0x156   :  { %1124 = vmatpush.msrb.mxu1 %v1038_v17  ;;  %1079 = vmatpush.msra.mxu3 %v972_v29  ;;  %v1018_v7 = vld [vmem:[#allocation14 + $0x320] sm:$0xff]  ;;  %v956_v10 = vld [vmem:[#allocation14 + $0x130] sm:$0xff]  ;;  %v949_v29 = vld [vmem:[#allocation14 + $0xf8] sm:$0xff] }
 0x157   :  { %1054 = vmatpush.msra.mxu2 %v944_v18  ;;  %1102 = vmatpush.msrb.mxu0 %v1004_v20  ;;  %v984_v13 = vld [vmem:[#allocation14 + $0x210] sm:$0xff]  ;;  %v922_v15 = vld [vmem:[#allocation14 + $0x20] sm:$0xff]  ;;  %v1045_v20 = vld [vmem:[#allocation14 + $0x3f8] sm:$0xff] }
 0x158   :  { %1125 = vmatpush.msrb.mxu1 %v1036_v21  ;;  %1080 = vmatpush.msra.mxu3 %v970_v33  ;;  %v1016_v14 = vld [vmem:[#allocation14 + $0x310] sm:$0xff]  ;;  %v954_v16 = vld [vmem:[#allocation14 + $0x120] sm:$0xff]  ;;  %v947_v33 = vld [vmem:[#allocation14 + $0xe8] sm:$0xff] }
 0x159   :  { %1055 = vmatpush.msra.mxu2 %v942_v22  ;;  %1103 = vmatpush.msrb.mxu0 %v1002_v25  ;;  %v982_v17 = vld [vmem:[#allocation14 + $0x200] sm:$0xff]  ;;  %v920_v21 = vld [vmem:[#allocation14 + $0x10] sm:$0xff] }
 0x15a   :  { %1126 = vmatpush.msrb.mxu1 %v1034_v26  ;;  %1081 = vmatpush.msra.mxu3 %v968_v38  ;;  %v1014_v18 = vld [vmem:[#allocation14 + $0x300] sm:$0xff]  ;;  %v952_v22 = vld [vmem:[#allocation14 + $0x110] sm:$0xff]  ;;  %v977_v38 = vld [vmem:[#allocation14 + $0x1d8] sm:$0xff] }
 0x15b   :  { %1056 = vmatpush.msra.mxu2 %v940_v28  ;;  %1104 = vmatpush.msrb.mxu0 %v1000_v30  ;;  %v918_v25 = vld [vmem:[#allocation14] sm:$0xff]  ;;  %v1041_v28 = vld [vmem:[#allocation14 + $0x3d8] sm:$0xff] }
 0x15c   :  { %1127 = vmatpush.msrb.mxu1 %v1032_v31  ;;  %1082 = vmatpush.msra.mxu3 %v966_v43  ;;  %v950_v26 = vld [vmem:[#allocation14 + $0x100] sm:$0xff]  ;;  %v981_v30 = vld [vmem:[#allocation14 + $0x1f8] sm:$0xff]  ;;  %v1007_v31 = vld [vmem:[#allocation14 + $0x2c8] sm:$0xff] }
 0x15d   :  { %1057 = vmatpush.msra.mxu2 %v938_v32  ;;  %1105 = vmatpush.msrb.mxu0 %v998_v34  ;;  %v1039_v32 = vld [vmem:[#allocation14 + $0x3c8] sm:$0xff]  ;;  %v1001_v43 = vld [vmem:[#allocation14 + $0x298] sm:$0xff] }
 0x15e   :  { %1128 = vmatpush.msrb.mxu1 %v1030_v35  ;;  %1083 = vmatpush.msra.mxu3 %v964_v49  ;;  %v979_v34 = vld [vmem:[#allocation14 + $0x1e8] sm:$0xff]  ;;  %v1005_v35 = vld [vmem:[#allocation14 + $0x2b8] sm:$0xff] }
 0x15f   :  { %1058 = vmatpush.msra.mxu2 %v936_v37  ;;  %1106 = vmatpush.msrb.mxu0 %v996_v40  ;;  %v945_v37 = vld [vmem:[#allocation14 + $0xd8] sm:$0xff]  ;;  %v1035_v40 = vld [vmem:[#allocation14 + $0x3a8] sm:$0xff] }
 0x160   :  { %1129 = vmatpush.msrb.mxu1 %v1028_v41  ;;  %1084 = vmatpush.msra.mxu3 %v962_v56  ;;  %v943_v41 = vld [vmem:[#allocation14 + $0xc8] sm:$0xff] }
 0x161   :  { %1059 = vmatpush.msra.mxu2 %v934_v42  ;;  %1107 = vmatpush.msrb.mxu0 %v994_v44  ;;  %v975_v42 = vld [vmem:[#allocation14 + $0x1c8] sm:$0xff]  ;;  %v1033_v44 = vld [vmem:[#allocation14 + $0x398] sm:$0xff] }
 0x162   :  { %1130 = vmatpush.msrb.mxu1 %v1026_v45  ;;  %1085 = vmatpush.msra.mxu3 %v960_v62  ;;  %v941_v45 = vld [vmem:[#allocation14 + $0xb8] sm:$0xff]  ;;  %v939_v49 = vld [vmem:[#allocation14 + $0xa8] sm:$0xff] }
 0x163   :  { %1060 = vmatpush.msra.mxu2 %v932_v48  ;;  %1108 = vmatpush.msrb.mxu0 %v992_v52  ;;  %v1031_v48 = vld [vmem:[#allocation14 + $0x388] sm:$0xff]  ;;  %v1029_v52 = vld [vmem:[#allocation14 + $0x378] sm:$0xff] }
 0x164   :  { %1131 = vmatpush.msrb.mxu1 %v1024_v53  ;;  %1086 = vmatpush.msra.mxu3 %v958_v4  ;;  %v937_v53 = vld [vmem:[#allocation14 + $0x98] sm:$0xff]  ;;  %v1027_v56 = vld [vmem:[#allocation14 + $0x368] sm:$0xff] }
 0x165   :  { %1061 = vmatpush.msra.mxu2 %v930_v55  ;;  %1109 = vmatpush.msrb.mxu0 %v990_v59  ;;  %v995_v55 = vld [vmem:[#allocation14 + $0x268] sm:$0xff]  ;;  %v993_v59 = vld [vmem:[#allocation14 + $0x258] sm:$0xff] }
 0x166   :  { %1132 = vmatpush.msrb.mxu1 %v1022_v60  ;;  %1087 = vmatpush.msra.mxu3 %v956_v10  ;;  %v1025_v60 = vld [vmem:[#allocation14 + $0x358] sm:$0xff]  ;;  %v959_v10 = vld [vmem:[#allocation14 + $0x148] sm:$0xff] }
 0x167   :  { %1062 = vmatpush.msra.mxu2 %v928_v61  ;;  %1110 = vmatpush.msrb.mxu0 %v988_v0  ;;  %v933_v61 = vld [vmem:[#allocation14 + $0x78] sm:$0xff]  ;;  %v1023_v0 = vld [vmem:[#allocation14 + $0x348] sm:$0xff] }
 0x168   :  { %1133 = vmatpush.msrb.mxu1 %v1020_v1  ;;  %1088 = vmatpush.msra.mxu3 %v954_v16  ;;  %v965_v62 = vld [vmem:[#allocation14 + $0x178] sm:$0xff]  ;;  %v931_v1 = vld [vmem:[#allocation14 + $0x68] sm:$0xff] }
 0x169   :  { %1063 = vmatpush.msra.mxu2 %v926_v3  ;;  %1111 = vmatpush.msrb.mxu0 %v986_v6  ;;  %v989_v3 = vld [vmem:[#allocation14 + $0x238] sm:$0xff]  ;;  %v1015_v16 = vld [vmem:[#allocation14 + $0x308] sm:$0xff] }
 0x16a   :  { %1134 = vmatpush.msrb.mxu1 %v1018_v7  ;;  %1089 = vmatpush.msra.mxu3 %v952_v22  ;;  %v1021_v4 = vld [vmem:[#allocation14 + $0x338] sm:$0xff]  ;;  %v987_v7 = vld [vmem:[#allocation14 + $0x228] sm:$0xff] }
 0x16b   :  { %1064 = vmatpush.msra.mxu2 %v924_v9  ;;  %1112 = vmatpush.msrb.mxu0 %v984_v13  ;;  %v961_v6 = vld [vmem:[#allocation14 + $0x158] sm:$0xff]  ;;  %v927_v9 = vld [vmem:[#allocation14 + $0x48] sm:$0xff] }
 0x16c   :  { %1135 = vmatpush.msrb.mxu1 %v1016_v14  ;;  %1090 = vmatpush.msra.mxu3 %v950_v26  ;;  %v925_v13 = vld [vmem:[#allocation14 + $0x38] sm:$0xff]  ;;  %v951_v22 = vld [vmem:[#allocation14 + $0x108] sm:$0xff] }
 0x16d   :  { %1065 = vmatpush.msra.mxu2 %v922_v15  ;;  %1113 = vmatpush.msrb.mxu0 %v982_v17  ;;  %v957_v14 = vld [vmem:[#allocation14 + $0x138] sm:$0xff]  ;;  %v983_v15 = vld [vmem:[#allocation14 + $0x208] sm:$0xff] }
 0x16e   :  { %1136 = vmatpush.msrb.mxu1 %v1014_v18  ;;  %v923_v17 = vld [vmem:[#allocation14 + $0x28] sm:$0xff] }
 0x16f   :  { %1066 = vmatpush.msra.mxu2 %v920_v21  ;;  %v955_v18 = vld [vmem:[#allocation14 + $0x128] sm:$0xff] }
 0x170   :  { %v919_v21 = vld [vmem:[#allocation14 + $0x8] sm:$0xff] }
 0x171   :  { %1067 = vmatpush.msra.mxu2 %v918_v25 }
 0x1b9   :  { %v692_v39 = vpop.f32.mrf.mxu3 }
 0x1bf   :  { %v669_v24 = vpop.f32.mrf.mxu2 }
 0x1c0   :  { %v670_v36 = vadd.f32 %v1369_v27, %v669_v24  ;;  %v1043_v24 = vld [vmem:[#allocation14 + $0x3e8] sm:$0xff] }
 0x1c1   :  { %v695_v63 = vpop.f32.mrf.mxu3 }
 0x1c2   :  { %v693_v47 = vadd.f32 %v692_v39, %v670_v36  ;;  %v1037_v36 = vld [vmem:[#allocation14 + $0x3b8] sm:$0xff]  ;;  %v1003_v39 = vld [vmem:[#allocation14 + $0x2a8] sm:$0xff] }
 0x1c3   :  { %v738_v46 = vpop.f32.mrf.mxu1 }
 0x1c7   :  { %v672_v50 = vpop.f32.mrf.mxu2 }
 0x1c8   :  { %v673_v57 = vadd.f32 %v1369_v27, %v672_v50  ;;  %v1009_v27 = vld [vmem:[#allocation14 + $0x2d8] sm:$0xff]  ;;  %v971_v50 = vld [vmem:[#allocation14 + $0x1a8] sm:$0xff] }
 0x1c9   :  { %v715_v51 = vpop.f32.mrf.mxu0 }
 0x1ca   :  { %v716_v54 = vadd.f32 %v715_v51, %v693_v47  ;;  %v696_v2 = vadd.f32 %v695_v63, %v673_v57  ;;  %v999_v47 = vld [vmem:[#allocation14 + $0x288] sm:$0xff]  ;;  %v997_v51 = vld [vmem:[#allocation14 + $0x278] sm:$0xff] }
 0x1cb   :  { %v741_v11 = vpop.f32.mrf.mxu1  ;;  %v935_v57 = vld [vmem:[#allocation14 + $0x88] sm:$0xff] }
 0x1cc   :  { %v739_v58 = vadd.f32 %v738_v46, %v716_v54  ;;  %v973_v46 = vld [vmem:[#allocation14 + $0x1b8] sm:$0xff]  ;;  %v991_v63 = vld [vmem:[#allocation14 + $0x248] sm:$0xff] }
 0x1cd   :  { %v969_v54 = vld [vmem:[#allocation14 + $0x198] sm:$0xff] }
 0x1ce   :  { %834 = vmatmul.f32.vlgmr.msrb.gmra.mxu2 %v739_v58  ;;  %857 = vmatmul.f32.vlgmr.msrb.gmra.mxu3 %v739_v58 }
 0x1cf   :  { %880 = vmatmul.f32.vlgmr.msra.gmra.mxu0 %v739_v58  ;;  %903 = vmatmul.f32.vlgmr.msra.gmra.mxu1 %v739_v58  ;;  %v967_v58 = vld [vmem:[#allocation14 + $0x188] sm:$0xff] }
 0x1d0   :  { %1190 = vmatpush.msra.mxu0 %v1013_v19  ;;  %1213 = vmatpush.msra.mxu1 %v1045_v20  ;;  %v921_v19 = vld [vmem:[#allocation14 + $0x18] sm:$0xff] }
 0x1d1   :  { %v718_v5 = vpop.f32.mrf.mxu0  ;;  %1144 = vmatpush.msrb.mxu2 %v949_v29  ;;  %1167 = vmatpush.msrb.mxu3 %v981_v30  ;;  %v953_v20 = vld [vmem:[#allocation14 + $0x118] sm:$0xff] }
 0x1d2   :  { %v719_v8 = vadd.f32 %v718_v5, %v696_v2  ;;  %1191 = vmatpush.msra.mxu0 %v1011_v23  ;;  %1214 = vmatpush.msra.mxu1 %v1043_v24  ;;  %v963_v2 = vld [vmem:[#allocation14 + $0x168] sm:$0xff]  ;;  %v929_v5 = vld [vmem:[#allocation14 + $0x58] sm:$0xff] }
 0x1d3   :  { %1145 = vmatpush.msrb.mxu2 %v947_v33  ;;  %1168 = vmatpush.msrb.mxu3 %v979_v34  ;;  %v808_v23 = vld [vmem:[%s1787_s8] sm:$0xf] }
 0x1d4   :  { %v742_v12 = vadd.f32 %v741_v11, %v719_v8  ;;  %1192 = vmatpush.msra.mxu0 %v1009_v27  ;;  %1215 = vmatpush.msra.mxu1 %v1041_v28  ;;  %v1019_v8 = vld [vmem:[#allocation14 + $0x328] sm:$0xff]  ;;  %v985_v11 = vld [vmem:[#allocation14 + $0x218] sm:$0xff]  ;;  %v812_v24 = vperm.slane %v808_v23, 2  ;;  %v813_v25 = vperm.slane %v808_v23, 3  ;;  %v810_v30 = vperm.slane %v808_v23, 0 }
 0x1d5   :  { %1146 = vmatpush.msrb.mxu2 %v945_v37  ;;  %1169 = vmatpush.msrb.mxu3 %v977_v38 }
 0x1d6   :  { %837 = vmatmul.f32.gmra.mxu2 %v742_v12  ;;  %860 = vmatmul.f32.gmra.mxu3 %v742_v12 }
 0x1d7   :  { %883 = vmatmul.f32.gmra.mxu0 %v742_v12  ;;  %906 = vmatmul.f32.gmra.mxu1 %v742_v12  ;;  %v1017_v12 = vld [vmem:[#allocation14 + $0x318] sm:$0xff] }
 0x1d8   :  { %1193 = vmatpush.msra.mxu0 %v1007_v31  ;;  %1216 = vmatpush.msra.mxu1 %v1039_v32  ;;  %v811_v31 = vperm.slane %v808_v23, 1 }
 0x1d9   :  { %1147 = vmatpush.msrb.mxu2 %v943_v41  ;;  %1170 = vmatpush.msrb.mxu3 %v975_v42  ;;  %v1255_v42 = vld [vmem:[#allocation16 + $0x78] sm:$0xff] }
 0x1da   :  { %1194 = vmatpush.msra.mxu0 %v1005_v35  ;;  %1217 = vmatpush.msra.mxu1 %v1037_v36 }
 0x1db   :  { %1148 = vmatpush.msrb.mxu2 %v941_v45  ;;  %1171 = vmatpush.msrb.mxu3 %v973_v46 }
 0x1dc   :  { %1195 = vmatpush.msra.mxu0 %v1003_v39  ;;  %1218 = vmatpush.msra.mxu1 %v1035_v40 }
 0x1dd   :  { %1149 = vmatpush.msrb.mxu2 %v939_v49  ;;  %1172 = vmatpush.msrb.mxu3 %v971_v50  ;;  %v1253_v50 = vld [vmem:[#allocation16 + $0x68] sm:$0xff] }
 0x1de   :  { %1196 = vmatpush.msra.mxu0 %v1001_v43  ;;  %1219 = vmatpush.msra.mxu1 %v1033_v44 }
 0x1df   :  { %1150 = vmatpush.msrb.mxu2 %v937_v53  ;;  %1173 = vmatpush.msrb.mxu3 %v969_v54 }
 0x1e0   :  { %1197 = vmatpush.msra.mxu0 %v999_v47  ;;  %1220 = vmatpush.msra.mxu1 %v1031_v48  ;;  %v1254_v47 = vld [vmem:[#allocation16 + $0x70] sm:$0xff] }
 0x1e1   :  { %1151 = vmatpush.msrb.mxu2 %v935_v57  ;;  %1174 = vmatpush.msrb.mxu3 %v967_v58  ;;  %v1250_v57 = vld [vmem:[#allocation16 + $0x50] sm:$0xff]  ;;  %v1249_v58 = vld [vmem:[#allocation16 + $0x48] sm:$0xff] }
 0x1e2   :  { %1198 = vmatpush.msra.mxu0 %v997_v51  ;;  %1221 = vmatpush.msra.mxu1 %v1029_v52 }
 0x1e3   :  { %1152 = vmatpush.msrb.mxu2 %v933_v61  ;;  %1175 = vmatpush.msrb.mxu3 %v965_v62  ;;  %v1271_v61 = vld [vmem:[#allocation16 + $0xf8] sm:$0xff]  ;;  %v1246_v62 = vld [vmem:[#allocation16 + $0x30] sm:$0xff] }
 0x1e4   :  { %1199 = vmatpush.msra.mxu0 %v995_v55  ;;  %1222 = vmatpush.msra.mxu1 %v1027_v56  ;;  %v1252_v55 = vld [vmem:[#allocation16 + $0x60] sm:$0xff]  ;;  %v1251_v56 = vld [vmem:[#allocation16 + $0x58] sm:$0xff] }
 0x1e5   :  { %1153 = vmatpush.msrb.mxu2 %v931_v1  ;;  %1176 = vmatpush.msrb.mxu3 %v963_v2  ;;  %v1269_v1 = vld [vmem:[#allocation16 + $0xe8] sm:$0xff]  ;;  %v1244_v2 = vld [vmem:[#allocation16 + $0x20] sm:$0xff] }
 0x1e6   :  { %1200 = vmatpush.msra.mxu0 %v993_v59  ;;  %1223 = vmatpush.msra.mxu1 %v1025_v60  ;;  %v1248_v59 = vld [vmem:[#allocation16 + $0x40] sm:$0xff]  ;;  %v1247_v60 = vld [vmem:[#allocation16 + $0x38] sm:$0xff] }
 0x1e7   :  { %1154 = vmatpush.msrb.mxu2 %v929_v5  ;;  %1177 = vmatpush.msrb.mxu3 %v961_v6  ;;  %v1267_v5 = vld [vmem:[#allocation16 + $0xd8] sm:$0xff]  ;;  %v1242_v6 = vld [vmem:[#allocation16 + $0x10] sm:$0xff] }
 0x1e8   :  { %1201 = vmatpush.msra.mxu0 %v991_v63  ;;  %1224 = vmatpush.msra.mxu1 %v1023_v0  ;;  %v1270_v63 = vld [vmem:[#allocation16 + $0xf0] sm:$0xff]  ;;  %v1245_v0 = vld [vmem:[#allocation16 + $0x28] sm:$0xff] }
 0x1e9   :  { %1155 = vmatpush.msrb.mxu2 %v927_v9  ;;  %1178 = vmatpush.msrb.mxu3 %v959_v10  ;;  %v1265_v9 = vld [vmem:[#allocation16 + $0xc8] sm:$0xff]  ;;  %v1240_v10 = vld [vmem:[#allocation16] sm:$0xff] }
 0x1ea   :  { %1202 = vmatpush.msra.mxu0 %v989_v3  ;;  %1225 = vmatpush.msra.mxu1 %v1021_v4  ;;  %v1268_v3 = vld [vmem:[#allocation16 + $0xe0] sm:$0xff]  ;;  %v1243_v4 = vld [vmem:[#allocation16 + $0x18] sm:$0xff] }
 0x1eb   :  { %1156 = vmatpush.msrb.mxu2 %v925_v13  ;;  %1179 = vmatpush.msrb.mxu3 %v957_v14  ;;  %v1262_v13 = vld [vmem:[#allocation16 + $0xb0] sm:$0xff]  ;;  %v1261_v14 = vld [vmem:[#allocation16 + $0xa8] sm:$0xff] }
 0x1ec   :  { %1203 = vmatpush.msra.mxu0 %v987_v7  ;;  %1226 = vmatpush.msra.mxu1 %v1019_v8  ;;  %v1266_v7 = vld [vmem:[#allocation16 + $0xd0] sm:$0xff]  ;;  %v1241_v8 = vld [vmem:[#allocation16 + $0x8] sm:$0xff] }
 0x1ed   :  { %1157 = vmatpush.msrb.mxu2 %v923_v17  ;;  %1180 = vmatpush.msrb.mxu3 %v955_v18  ;;  %v1258_v17 = vld [vmem:[#allocation16 + $0x90] sm:$0xff]  ;;  %v1257_v18 = vld [vmem:[#allocation16 + $0x88] sm:$0xff] }
 0x1ee   :  { %1204 = vmatpush.msra.mxu0 %v985_v11  ;;  %1227 = vmatpush.msra.mxu1 %v1017_v12  ;;  %v1264_v11 = vld [vmem:[#allocation16 + $0xc0] sm:$0xff]  ;;  %v1263_v12 = vld [vmem:[#allocation16 + $0xb8] sm:$0xff] }
 0x1ef   :  { %1158 = vmatpush.msrb.mxu2 %v921_v19  ;;  %1181 = vmatpush.msrb.mxu3 %v953_v20  ;;  %v1046_v19 = vld [vmem:[%s1789_s10] sm:$0x3]  ;;  %v1256_v20 = vld [vmem:[#allocation16 + $0x80] sm:$0xff] }
 0x1f0   :  { %1205 = vmatpush.msra.mxu0 %v983_v15  ;;  %1228 = vmatpush.msra.mxu1 %v1015_v16  ;;  %v1260_v15 = vld [vmem:[#allocation16 + $0xa0] sm:$0xff]  ;;  %v1259_v16 = vld [vmem:[#allocation16 + $0x98] sm:$0xff] }
 0x1f1   :  { %1159 = vmatpush.msrb.mxu2 %v919_v21  ;;  %1182 = vmatpush.msrb.mxu3 %v951_v22  ;;  %v1048_v22 = vperm.slane %v1046_v19, 0 }
 0x24c   :  { %v881_v26 = vpop.f32.mrf.mxu0  ;;  %v904_v27 = vpop.f32.mrf.mxu1 }
 0x24d   :  { %v882_v28 = vadd.f32 %v881_v26, %v812_v24  ;;  %v905_v29 = vadd.f32 %v904_v27, %v813_v25 }
 0x24f   :  { %v912_v32 = vmax.f32 %v882_v28, 0.0  ;;  %v913_v33 = vmax.f32 %v905_v29, 0.0 }
 0x251   :  { %1114 = vmatmul.f32.vlgmr.msrb.gmra.mxu0 %v912_v32  ;;  %1137 = vmatmul.f32.vlgmr.msrb.gmra.mxu1 %v913_v33  ;;  %v835_v34 = vpop.f32.mrf.mxu2  ;;  %v858_v35 = vpop.f32.mrf.mxu3 }
 0x252   :  { %v836_v36 = vadd.f32 %v835_v34, %v810_v30  ;;  %v859_v37 = vadd.f32 %v858_v35, %v811_v31 }
 0x254   :  { %v910_v38 = vmax.f32 %v836_v36, 0.0  ;;  %v911_v39 = vmax.f32 %v859_v37, 0.0  ;;  %v884_v40 = vpop.f32.mrf.mxu0  ;;  %v907_v41 = vpop.f32.mrf.mxu1 }
 0x255   :  { %v885_v43 = vadd.f32 %v884_v40, %v812_v24  ;;  %v908_v44 = vadd.f32 %v907_v41, %v813_v25 }
 0x256   :  { %1068 = vmatmul.f32.vlgmr.msra.gmra.mxu2 %v910_v38  ;;  %1091 = vmatmul.f32.vlgmr.msra.gmra.mxu3 %v911_v39 }
 0x257   :  { %v916_v45 = vmax.f32 %v885_v43, 0.0  ;;  %v917_v46 = vmax.f32 %v908_v44, 0.0  ;;  %1276 = vmatpush.msra.mxu2 %v1255_v42  ;;  %1299 = vmatpush.msra.mxu3 %v1271_v61 }
 0x259   :  { %1117 = vmatmul.f32.gmra.mxu0 %v916_v45  ;;  %1140 = vmatmul.f32.gmra.mxu1 %v917_v46  ;;  %v838_v48 = vpop.f32.mrf.mxu2  ;;  %v861_v49 = vpop.f32.mrf.mxu3 }
 0x25a   :  { %v839_v51 = vadd.f32 %v838_v48, %v810_v30  ;;  %v862_v52 = vadd.f32 %v861_v49, %v811_v31  ;;  %1277 = vmatpush.msra.mxu2 %v1254_v47  ;;  %1300 = vmatpush.msra.mxu3 %v1270_v63 }
 0x25c   :  { %v914_v53 = vmax.f32 %v839_v51, 0.0  ;;  %v915_v54 = vmax.f32 %v862_v52, 0.0  ;;  %1278 = vmatpush.msra.mxu2 %v1253_v50  ;;  %1301 = vmatpush.msra.mxu3 %v1269_v1 }
 0x25e   :  { %1071 = vmatmul.f32.gmra.mxu2 %v914_v53  ;;  %1094 = vmatmul.f32.gmra.mxu3 %v915_v54 }
 0x25f   :  { %1279 = vmatpush.msra.mxu2 %v1252_v55  ;;  %1302 = vmatpush.msra.mxu3 %v1268_v3 }
 0x261   :  { %1206 = vmatmul.f32.vlgmr.msra.gmra.mxu0 %v912_v32  ;;  %1229 = vmatmul.f32.vlgmr.msra.gmra.mxu1 %v913_v33 }
 0x262   :  { %1280 = vmatpush.msra.mxu2 %v1251_v56  ;;  %1303 = vmatpush.msra.mxu3 %v1267_v5 }
 0x264   :  { %1281 = vmatpush.msra.mxu2 %v1250_v57  ;;  %1304 = vmatpush.msra.mxu3 %v1266_v7 }
 0x266   :  { %1160 = vmatmul.f32.vlgmr.msrb.gmra.mxu2 %v910_v38  ;;  %1183 = vmatmul.f32.vlgmr.msrb.gmra.mxu3 %v911_v39  ;;  %v1049_v38 = vperm.slane %v1046_v19, 1 }
 0x267   :  { %1282 = vmatpush.msra.mxu2 %v1249_v58  ;;  %1305 = vmatpush.msra.mxu3 %v1265_v9 }
 0x269   :  { %1209 = vmatmul.f32.gmra.mxu0 %v916_v45  ;;  %1232 = vmatmul.f32.gmra.mxu1 %v917_v46 }
 0x26a   :  { %1283 = vmatpush.msra.mxu2 %v1248_v59  ;;  %1306 = vmatpush.msra.mxu3 %v1264_v11 }
 0x26c   :  { %1284 = vmatpush.msra.mxu2 %v1247_v60  ;;  %1307 = vmatpush.msra.mxu3 %v1263_v12  ;;  %v1370_v60 = vld [vmem:[%s1791_s12] ss:$0 sm:$0xff] }
 0x26e   :  { %1163 = vmatmul.f32.gmra.mxu2 %v914_v53  ;;  %1186 = vmatmul.f32.gmra.mxu3 %v915_v54 }
 0x26f   :  { %1285 = vmatpush.msra.mxu2 %v1246_v62  ;;  %1308 = vmatpush.msra.mxu3 %v1262_v13 }
 0x271   :  { %1286 = vmatpush.msra.mxu2 %v1245_v0  ;;  %1309 = vmatpush.msra.mxu3 %v1261_v14 }
 0x273   :  { %1287 = vmatpush.msra.mxu2 %v1244_v2  ;;  %1310 = vmatpush.msra.mxu3 %v1260_v15 }
 0x275   :  { %1288 = vmatpush.msra.mxu2 %v1243_v4  ;;  %1311 = vmatpush.msra.mxu3 %v1259_v16 }
 0x277   :  { %1289 = vmatpush.msra.mxu2 %v1242_v6  ;;  %1312 = vmatpush.msra.mxu3 %v1258_v17 }
 0x279   :  { %1290 = vmatpush.msra.mxu2 %v1241_v8  ;;  %1313 = vmatpush.msra.mxu3 %v1257_v18 }
 0x27b   :  { %1291 = vmatpush.msra.mxu2 %v1240_v10  ;;  %1314 = vmatpush.msra.mxu3 %v1256_v20 }
 0x2ce   :  { %v1115_v21 = vpop.f32.mrf.mxu0  ;;  %v1138_v23 = vpop.f32.mrf.mxu1 }
 0x2d6   :  { %v1118_v29 = vpop.f32.mrf.mxu0  ;;  %v1141_v35 = vpop.f32.mrf.mxu1 }
 0x2d9   :  { %v1069_v24 = vpop.f32.mrf.mxu2  ;;  %v1092_v25 = vpop.f32.mrf.mxu3 }
 0x2da   :  { %v1070_v26 = vadd.f32 %v1069_v24, %v1048_v22 }
 0x2dc   :  { %v1093_v27 = vadd.f32 %v1092_v25, %v1070_v26 }
 0x2de   :  { %v1116_v28 = vadd.f32 %v1115_v21, %v1093_v27  ;;  %v1207_v44 = vpop.f32.mrf.mxu0  ;;  %v1230_v46 = vpop.f32.mrf.mxu1 }
 0x2e0   :  { %v1139_v30 = vadd.f32 %v1138_v23, %v1116_v28 }
 0x2e1   :  { %v1072_v31 = vpop.f32.mrf.mxu2  ;;  %v1095_v32 = vpop.f32.mrf.mxu3 }
 0x2e2   :  { %v1236_v33 = vmax.f32 %v1139_v30, 0.0  ;;  %v1073_v34 = vadd.f32 %v1072_v31, %v1048_v22 }
 0x2e4   :  { %v1096_v36 = vadd.f32 %v1095_v32, %v1073_v34  ;;  %1292 = vmatmul.f32.vlgmr.msra.gmra.mxu2 %v1236_v33 }
 0x2e6   :  { %v1119_v37 = vadd.f32 %v1118_v29, %v1096_v36  ;;  %v1210_v54 = vpop.f32.mrf.mxu0  ;;  %v1233_v56 = vpop.f32.mrf.mxu1 }
 0x2e8   :  { %v1142_v39 = vadd.f32 %v1141_v35, %v1119_v37 }
 0x2e9   :  { %v1161_v40 = vpop.f32.mrf.mxu2  ;;  %v1184_v41 = vpop.f32.mrf.mxu3 }
 0x2ea   :  { %v1162_v42 = vadd.f32 %v1161_v40, %v1049_v38  ;;  %v1238_v43 = vmax.f32 %v1142_v39, 0.0 }
 0x2ec   :  { %v1185_v45 = vadd.f32 %v1184_v41, %v1162_v42  ;;  %1295 = vmatmul.f32.gmra.mxu2 %v1238_v43 }
 0x2ee   :  { %v1208_v47 = vadd.f32 %v1207_v44, %v1185_v45 }
 0x2f0   :  { %v1231_v48 = vadd.f32 %v1230_v46, %v1208_v47 }
 0x2f1   :  { %v1164_v49 = vpop.f32.mrf.mxu2  ;;  %v1187_v52 = vpop.f32.mrf.mxu3 }
 0x2f2   :  { %v1237_v50 = vmax.f32 %v1231_v48, 0.0  ;;  %v1165_v51 = vadd.f32 %v1164_v49, %v1049_v38 }
 0x2f4   :  { %v1188_v53 = vadd.f32 %v1187_v52, %v1165_v51  ;;  %1315 = vmatmul.f32.vlgmr.msra.gmra.mxu3 %v1237_v50 }
 0x2f6   :  { %v1211_v55 = vadd.f32 %v1210_v54, %v1188_v53 }
 0x2f8   :  { %v1234_v57 = vadd.f32 %v1233_v56, %v1211_v55 }
 0x2fa   :  { %v1239_v58 = vmax.f32 %v1234_v57, 0.0 }
 0x2fc   :  { %1318 = vmatmul.f32.gmra.mxu3 %v1239_v58 }
 0x367   :  { %v1293_v59 = vpop.f32.mrf.mxu2 }
 0x368   :  { %v1294_v61 = vadd.f32 %v1370_v60, %v1293_v59 }
 0x36f   :  { %v1296_v1 = vpop.f32.mrf.mxu2 }
 0x370   :  { %v1297_v2 = vadd.f32 %v1370_v60, %v1296_v1 }
 0x377   :  { %v1316_v62 = vpop.f32.mrf.mxu3 }
 0x378   :  { %v1317_v63 = vadd.f32 %v1316_v62, %v1294_v61 }
 0x37a   :  { %v1322_v0 = vmax.f32 %v1317_v63, 0.0 }
 0x37c   :  { %1324 = vst [vmem:[#allocation17] sm:$0xff] %v1322_v0 }
 0x37f   :  { %v1319_v3 = vpop.f32.mrf.mxu3 }
 0x380   :  { %v1320_v4 = vadd.f32 %v1319_v3, %v1297_v2 }
 0x382   :  { %v1323_v5 = vmax.f32 %v1320_v4, 0.0 }
 0x384   :  { %1325 = vst [vmem:[#allocation17 + $0x8] sm:$0xff] %v1323_v5 }
 0x385   :  { %1338 = dma.vmem_to_hbm [thread:$0]  %s1331_s24, 256, %s1333_s25, [#allocation4], %s1630_s28, %s1630_s28, %s1631_s29  }
 0x386   :  { %1621 = dma.done.wait [#allocation4], 256  }
 0x387   :  { %1622 = vsyncadd [#allocation4], 4294967040 }
 0x388   :  { %1343 = vsyncpa [#allocation3], 1 }
 0x389   :  { %1344 = vsyncpa [#allocation6], 1 }
 0x38a   :  { %1345 = vsyncpa [#allocation9], 1 }
 0x38b   :  { %1346 = vsyncpa [#allocation12], 1 }
 0x38c   :  { %1347 = vsyncpa [#allocation15], 1 }
 0x38d   :  { %1348 = vsyncpa [#allocation4], 1 }

</bundles_post_ra>
